<compile_context>
chip_gen: v7x
topology: tpu7x:2x2x1
jax: 0.10.0
libtpu: 0.0.40
codegen_flags: <defaults>
</compile_context>

<pallas_src>
import functools
from math import sqrt

import jax
import jax.numpy as jnp
import numpy as np
from jax.experimental import pallas as pl
from jax.experimental.pallas import tpu as pltpu


# -----------------------------------------------------------------------------
# Pallas kernel
# -----------------------------------------------------------------------------
def _layernorm(x, gamma, beta, eps=1e-3):
    # PyTorch module constructs its LayerNorms with eps=0.001 explicitly.
    mean = jnp.mean(x, axis=-1, keepdims=True)
    var = jnp.mean((x - mean) ** 2, axis=-1, keepdims=True)
    return (x - mean) * jax.lax.rsqrt(var + eps) * gamma + beta


def slot_attention_kernel(
    # inputs (batched)
    x_ref, slots0_ref,
    # packed parameters (shared across the grid)
    wkv_ref,    # (C, 2D) bf16 : [Wk | Wv]
    wq_ref,     # (D, D)  bf16 : Wq * scale
    wgi_ref,    # (D, 3D) bf16 : GRU input weights  [r | z | n]
    wgh_ref,    # (D, 3D) bf16 : GRU hidden weights [r | z | n]
    w1_ref,     # (D, M)  bf16 : MLP layer 1
    w2_ref,     # (M, D)  bf16 : MLP layer 2
    vecd_ref,   # (9, D)  f32  : b_r, b_z, b_in, b_hn, b2, g_s, be_s, g_ff, be_ff
    vecc_ref,   # (2, C)  f32  : g_in, beta_in
    b1_ref,     # (1, M)  f32  : MLP layer-1 bias
    # outputs
    out_ref,
    *, attention_iters, eps, latent,
):
    f32, bf16 = jnp.float32, jnp.bfloat16
    D = latent

    vd = vecd_ref[...]
    b_r, b_z = vd[0:1], vd[1:2]
    b_in, b_hn = vd[2:3], vd[3:4]
    b2 = vd[4:5]
    g_s, be_s = vd[5:6], vd[6:7]
    g_ff, be_ff = vd[7:8], vd[8:9]
    vc = vecc_ref[...]
    g_in, be_in = vc[0:1], vc[1:2]
    b1 = b1_ref[...]

    # --- loop-invariant work: layernorm(inputs), fused K/V projection ---------
    x = x_ref[0]                                                    # (N, C) f32
    xn = _layernorm(x, g_in, be_in)
    kv = jnp.dot(xn.astype(bf16), wkv_ref[...],
                 preferred_element_type=f32)                        # (N, 2D)
    kT = kv[:, :D].T.astype(bf16)        # (D, N), transpose hoisted out of loop
    v_bf = kv[:, D:].astype(bf16)        # (N, D)

    slots = slots0_ref[0]                                           # (S, D) f32

    for _ in range(attention_iters):
        slots_prev = slots

        sn = _layernorm(slots, g_s, be_s)
        # scale is folded into wq_ref
        q = jnp.dot(sn.astype(bf16), wq_ref[...],
                    preferred_element_type=f32)                     # (S, D)

        dots = jnp.dot(q.astype(bf16), kT, preferred_element_type=f32)   # (S, N)

        # softmax over the SLOT axis (torch: dim=1 of (B, S, N))
        dots = dots - jnp.max(dots, axis=0, keepdims=True)
        e = jnp.exp(dots)
        attn = e * pl.reciprocal(jnp.sum(e, axis=0, keepdims=True), approx=True)
        attn = attn + eps
        attn = attn * pl.reciprocal(jnp.sum(attn, axis=-1, keepdims=True),
                                    approx=True)                    # (S, N)

        updates = jnp.dot(attn.astype(bf16), v_bf,
                          preferred_element_type=f32)               # (S, D)

        # GRUCell(updates, slots_prev) -- fused gate matmuls, gate order r,z,n
        gi = jnp.dot(updates.astype(bf16), wgi_ref[...],
                     preferred_element_type=f32)                    # (S, 3D)
        gh = jnp.dot(slots_prev.astype(bf16), wgh_ref[...],
                     preferred_element_type=f32)                    # (S, 3D)

        r = jax.nn.sigmoid(gi[:, 0:D] + gh[:, 0:D] + b_r)
        z = jax.nn.sigmoid(gi[:, D:2 * D] + gh[:, D:2 * D] + b_z)
        nh = jnp.tanh(gi[:, 2 * D:] + b_in + r * (gh[:, 2 * D:] + b_hn))
        slots = (1.0 - z) * nh + z * slots_prev

        # residual MLP
        pre = _layernorm(slots, g_ff, be_ff)
        h1 = jnp.maximum(
            jnp.dot(pre.astype(bf16), w1_ref[...],
                    preferred_element_type=f32) + b1, 0.0)
        slots = slots + jnp.dot(h1.astype(bf16), w2_ref[...],
                                preferred_element_type=f32) + b2

    out_ref[0] = slots


# -----------------------------------------------------------------------------
# Parameter packing (done once in the wrapper, outside the kernel)
# -----------------------------------------------------------------------------
def pack_params(params, scale):
    bf16 = jnp.bfloat16
    return dict(
        w_kv=jnp.concatenate([params["wk_t"], params["wv_t"]], axis=1).astype(bf16),
        wq_s=(params["wq_t"] * scale).astype(bf16),
        w_gi=jnp.concatenate(
            [params["wir_t"], params["wiz_t"], params["win_t"]], axis=1).astype(bf16),
        w_gh=jnp.concatenate(
            [params["whr_t"], params["whz_t"], params["whn_t"]], axis=1).astype(bf16),
        w1=params["w1_t"].astype(bf16),
        w2=params["w2_t"].astype(bf16),
        vec_d=jnp.concatenate([
            params["b_ir"] + params["b_hr"],        # folded r-gate bias
            params["b_iz"] + params["b_hz"],        # folded z-gate bias
            params["b_in"], params["b_hn"], params["b2"],
            params["g_slots"], params["beta_slots"],
            params["g_ff"], params["beta_ff"],
        ], axis=0).astype(jnp.float32),             # (9, D)
        vec_c=jnp.concatenate([params["g_in"], params["beta_in"]],
                              axis=0).astype(jnp.float32),            # (2, C)
        b1=params["b1"].astype(jnp.float32),                          # (1, M)
    )


# -----------------------------------------------------------------------------
# Wrapper
# -----------------------------------------------------------------------------
def slot_attention_pallas(x, slots0, params, *, attention_iters, scale, eps):
    B, N, C = x.shape
    _, S, D = slots0.shape
    pk = pack_params(params, scale)

    operands = [
        x, slots0,
        pk["w_kv"], pk["wq_s"], pk["w_gi"], pk["w_gh"],
        pk["w1"], pk["w2"], pk["vec_d"], pk["vec_c"], pk["b1"],
    ]

    def shared(arr):
        return pl.BlockSpec(arr.shape, lambda i: (0, 0))

    in_specs = [
        pl.BlockSpec((1, N, C), lambda i: (i, 0, 0)),
        pl.BlockSpec((1, S, D), lambda i: (i, 0, 0)),
    ] + [shared(a) for a in operands[2:]]

    kernel = functools.partial(
        slot_attention_kernel,
        attention_iters=attention_iters, eps=eps, latent=D)

    # grid=(B,) kept "parallel": on v7x the two batch elements land on the two
    # TensorCores; on single-TC v5e/v6e the packed params keep per-step DMA /
    # setup cost low (constant block index => params are not re-fetched).
    return pl.pallas_call(
        kernel,
        out_shape=jax.ShapeDtypeStruct((B, S, D), jnp.float32),
        grid=(B,),
        in_specs=in_specs,
        out_specs=pl.BlockSpec((1, S, D), lambda i: (i, 0, 0)),
        compiler_params=pltpu.CompilerParams(dimension_semantics=("parallel",)),
    )(*operands)


# -----------------------------------------------------------------------------
# Pure-JAX reference (for verification; full f32, HIGHEST precision)
# -----------------------------------------------------------------------------
def slot_attention_ref(x, slots0, params, *, attention_iters, scale, eps):
    hi = jax.lax.Precision.HIGHEST

    def ln(t, g, b, e=1e-3):
        m = jnp.mean(t, axis=-1, keepdims=True)
        v = jnp.mean((t - m) ** 2, axis=-1, keepdims=True)
        return (t - m) / jnp.sqrt(v + e) * g + b

    xn = ln(x, params["g_in"], params["beta_in"])
    k = jnp.einsum("bnc,cd->bnd", xn, params["wk_t"], precision=hi)
    v = jnp.einsum("bnc,cd->bnd", xn, params["wv_t"], precision=hi)

    slots = slots0
    for _ in range(attention_iters):
        slots_prev = slots
        sn = ln(slots, params["g_slots"], params["beta_slots"])
        q = jnp.einsum("bsd,de->bse", sn, params["wq_t"], precision=hi)
        dots = jnp.einsum("bid,bjd->bij", q, k, precision=hi) * scale
        attn = jax.nn.softmax(dots, axis=1) + eps
        attn = attn / jnp.sum(attn, axis=-1, keepdims=True)
        updates = jnp.einsum("bjd,bij->bid", v, attn, precision=hi)

        def mm(a, w):
            return jnp.einsum("bsd,de->bse", a, w, precision=hi)

        r = jax.nn.sigmoid(mm(updates, params["wir_t"]) + params["b_ir"]
                           + mm(slots_prev, params["whr_t"]) + params["b_hr"])
        z = jax.nn.sigmoid(mm(updates, params["wiz_t"]) + params["b_iz"]
                           + mm(slots_prev, params["whz_t"]) + params["b_hz"])
        nh = jnp.tanh(mm(updates, params["win_t"]) + params["b_in"]
                      + r * (mm(slots_prev, params["whn_t"]) + params["b_hn"]))
        slots = (1.0 - z) * nh + z * slots_prev

        pre = ln(slots, params["g_ff"], params["beta_ff"])
        h1 = jax.nn.relu(jnp.einsum("bsd,dm->bsm", pre, params["w1_t"],
                                    precision=hi) + params["b1"])
        slots = slots + jnp.einsum("bsm,md->bsd", h1, params["w2_t"],
                                   precision=hi) + params["b2"]
    return slots


# -----------------------------------------------------------------------------
# Deterministic parameter construction (shapes follow the PyTorch module)
# -----------------------------------------------------------------------------
def make_params(key, channels_enc, latent_size, mlp_size):
    M = max(latent_size, mlp_size)
    D, C = latent_size, channels_enc
    ks = jax.random.split(key, 16)

    def unif(k, shape, bound):
        return jax.random.uniform(k, shape, jnp.float32, -bound, bound)

    lin = lambda k, fan_in, shape: unif(k, shape, 1.0 / sqrt(fan_in))

    # GRU weights (PyTorch layout: (3*D, in), gate order r,z,n) then transposed splits.
    w_ih = lin(ks[3], D, (3 * D, D))
    w_hh = lin(ks[4], D, (3 * D, D))
    b_ih = lin(ks[5], D, (3 * D,))
    b_hh = lin(ks[6], D, (3 * D,))

    params = dict(
        wq_t=lin(ks[0], D, (D, D)).T,
        wk_t=lin(ks[1], C, (D, C)).T,
        wv_t=lin(ks[2], C, (D, C)).T,
        wir_t=w_ih[0:D].T, wiz_t=w_ih[D:2 * D].T, win_t=w_ih[2 * D:3 * D].T,
        whr_t=w_hh[0:D].T, whz_t=w_hh[D:2 * D].T, whn_t=w_hh[2 * D:3 * D].T,
        b_ir=b_ih[0:D].reshape(1, D), b_iz=b_ih[D:2 * D].reshape(1, D),
        b_in=b_ih[2 * D:3 * D].reshape(1, D),
        b_hr=b_hh[0:D].reshape(1, D), b_hz=b_hh[D:2 * D].reshape(1, D),
        b_hn=b_hh[2 * D:3 * D].reshape(1, D),
        w1_t=lin(ks[7], D, (M, D)).T, b1=lin(ks[8], D, (1, M)),
        w2_t=lin(ks[9], M, (D, M)).T, b2=lin(ks[10], M, (1, D)),
        g_in=jnp.ones((1, C), jnp.float32), beta_in=jnp.zeros((1, C), jnp.float32),
        g_slots=jnp.ones((1, D), jnp.float32), beta_slots=jnp.zeros((1, D), jnp.float32),
        g_ff=jnp.ones((1, D), jnp.float32), beta_ff=jnp.zeros((1, D), jnp.float32),
    )

    limit = sqrt(6.0 / (1 + D))
    slots_mu = unif(ks[11], (1, 1, D), limit)
    slots_log_sigma = unif(ks[12], (1, 1, D), limit)
    return params, slots_mu, slots_log_sigma


# -----------------------------------------------------------------------------
# Main
# -----------------------------------------------------------------------------
if __name__ == "__main__":
    # Small shapes consistent with the module's forward contract.
    B, N, C = 2, 64, 16          # inputs: (batch, tokens, channels_enc)
    D, S = 32, 8                 # latent_size, num_slots
    MLP = 64                     # mlp_size -> max(D, MLP) hidden units
    ITERS = 3
    EPS = 1e-8
    SCALE = D ** (-0.5)

    key = jax.random.PRNGKey(0)
    k_par, k_x, k_noise = jax.random.split(key, 3)

    params, slots_mu, slots_log_sigma = make_params(k_par, C, D, MLP)

    x = jax.random.normal(k_x, (B, N, C), jnp.float32)

    # slots = torch.normal(mu.expand(b,S,D), exp(log_sigma).expand(b,S,D))
    mu = jnp.broadcast_to(slots_mu, (B, S, D))
    sigma = jnp.broadcast_to(jnp.exp(slots_log_sigma), (B, S, D))
    slots0 = mu + sigma * jax.random.normal(k_noise, (B, S, D), jnp.float32)

    out = slot_attention_pallas(
        x, slots0, params, attention_iters=ITERS, scale=SCALE, eps=EPS)
    out = jax.block_until_ready(out)

    ref = jax.block_until_ready(
        slot_attention_ref(x, slots0, params,
                           attention_iters=ITERS, scale=SCALE, eps=EPS))

    assert out.shape == (B, S, D)
    # Kernel uses bf16 MXU inputs + approx reciprocal (f32 accumulation);
    # reference is full f32 at HIGHEST precision, hence the relaxed tolerance.
    np.testing.assert_allclose(np.asarray(out), np.asarray(ref), rtol=5e-2, atol=5e-2)
    print("KERNEL_OK")
</pallas_src>

<mosaic_0001>
module attributes {stable_mosaic.version = 11 : i64} {
  func.func @slot_attention_kernel(%arg0: i32, %arg1: memref<1x64x16xf32, #tpu.memory_space<vmem>>, %arg2: memref<1x8x32xf32, #tpu.memory_space<vmem>>, %arg3: memref<16x64xbf16, #tpu.memory_space<vmem>>, %arg4: memref<32x32xbf16, #tpu.memory_space<vmem>>, %arg5: memref<32x96xbf16, #tpu.memory_space<vmem>>, %arg6: memref<32x96xbf16, #tpu.memory_space<vmem>>, %arg7: memref<32x64xbf16, #tpu.memory_space<vmem>>, %arg8: memref<64x32xbf16, #tpu.memory_space<vmem>>, %arg9: memref<9x32xf32, #tpu.memory_space<vmem>>, %arg10: memref<2x16xf32, #tpu.memory_space<vmem>>, %arg11: memref<1x64xf32, #tpu.memory_space<vmem>>, %arg12: memref<1x8x32xf32, #tpu.memory_space<vmem>>) attributes {dimension_semantics = [#tpu.dimension_semantics<parallel>], iteration_bounds = array<i64: 2>, scalar_prefetch = 0 : i64, scratch_operands = 0 : i64, tpu.core_type = #tpu.core_type<tc>, window_params = [{transform_indices = @transform_0, window_bounds = array<i64: 1, 64, 16>}, {transform_indices = @transform_1, window_bounds = array<i64: 1, 8, 32>}, {pipeline_mode = #tpu.pipeline_mode<synchronous>, transform_indices = @transform_2, window_bounds = array<i64: 16, 64>}, {pipeline_mode = #tpu.pipeline_mode<synchronous>, transform_indices = @transform_3, window_bounds = array<i64: 32, 32>}, {pipeline_mode = #tpu.pipeline_mode<synchronous>, transform_indices = @transform_4, window_bounds = array<i64: 32, 96>}, {pipeline_mode = #tpu.pipeline_mode<synchronous>, transform_indices = @transform_5, window_bounds = array<i64: 32, 96>}, {pipeline_mode = #tpu.pipeline_mode<synchronous>, transform_indices = @transform_6, window_bounds = array<i64: 32, 64>}, {pipeline_mode = #tpu.pipeline_mode<synchronous>, transform_indices = @transform_7, window_bounds = array<i64: 64, 32>}, {pipeline_mode = #tpu.pipeline_mode<synchronous>, transform_indices = @transform_8, window_bounds = array<i64: 9, 32>}, {pipeline_mode = #tpu.pipeline_mode<synchronous>, transform_indices = @transform_9, window_bounds = array<i64: 2, 16>}, {pipeline_mode = #tpu.pipeline_mode<synchronous>, transform_indices = @transform_10, window_bounds = array<i64: 1, 64>}, {transform_indices = @transform_11, window_bounds = array<i64: 1, 8, 32>}]} {
    %c0 = arith.constant 0 : index
    %c0_0 = arith.constant 0 : index
    %0 = vector.load %arg9[%c0, %c0_0] : memref<9x32xf32, #tpu.memory_space<vmem>>, vector<9x32xf32>
    %1 = vector.extract_strided_slice %0 {offsets = [0, 0], sizes = [1, 32], strides = [1, 1]} : vector<9x32xf32> to vector<1x32xf32>
    %2 = vector.extract_strided_slice %0 {offsets = [1, 0], sizes = [1, 32], strides = [1, 1]} : vector<9x32xf32> to vector<1x32xf32>
    %3 = vector.extract_strided_slice %0 {offsets = [2, 0], sizes = [1, 32], strides = [1, 1]} : vector<9x32xf32> to vector<1x32xf32>
    %4 = vector.extract_strided_slice %0 {offsets = [3, 0], sizes = [1, 32], strides = [1, 1]} : vector<9x32xf32> to vector<1x32xf32>
    %5 = vector.extract_strided_slice %0 {offsets = [4, 0], sizes = [1, 32], strides = [1, 1]} : vector<9x32xf32> to vector<1x32xf32>
    %6 = vector.extract_strided_slice %0 {offsets = [5, 0], sizes = [1, 32], strides = [1, 1]} : vector<9x32xf32> to vector<1x32xf32>
    %7 = vector.extract_strided_slice %0 {offsets = [6, 0], sizes = [1, 32], strides = [1, 1]} : vector<9x32xf32> to vector<1x32xf32>
    %8 = vector.extract_strided_slice %0 {offsets = [7, 0], sizes = [1, 32], strides = [1, 1]} : vector<9x32xf32> to vector<1x32xf32>
    %9 = vector.extract_strided_slice %0 {offsets = [8, 0], sizes = [1, 32], strides = [1, 1]} : vector<9x32xf32> to vector<1x32xf32>
    %c0_1 = arith.constant 0 : index
    %c0_2 = arith.constant 0 : index
    %10 = vector.load %arg10[%c0_1, %c0_2] : memref<2x16xf32, #tpu.memory_space<vmem>>, vector<2x16xf32>
    %11 = vector.extract_strided_slice %10 {offsets = [0, 0], sizes = [1, 16], strides = [1, 1]} : vector<2x16xf32> to vector<1x16xf32>
    %12 = vector.extract_strided_slice %10 {offsets = [1, 0], sizes = [1, 16], strides = [1, 1]} : vector<2x16xf32> to vector<1x16xf32>
    %c0_3 = arith.constant 0 : index
    %c0_4 = arith.constant 0 : index
    %13 = vector.load %arg11[%c0_3, %c0_4] : memref<1x64xf32, #tpu.memory_space<vmem>>, vector<1x64xf32>
    %c0_5 = arith.constant 0 : index
    %c0_6 = arith.constant 0 : index
    %c0_7 = arith.constant 0 : index
    %14 = vector.load %arg1[%c0_5, %c0_6, %c0_7] : memref<1x64x16xf32, #tpu.memory_space<vmem>>, vector<1x64x16xf32>
    %15 = vector.shape_cast %14 : vector<1x64x16xf32> to vector<64x16xf32>
    %cst = arith.constant dense<0.000000e+00> : vector<64xf32>
    %16 = vector.multi_reduction <add>, %15, %cst [1] : vector<64x16xf32> to vector<64xf32>
    %17 = vector.shape_cast %16 : vector<64xf32> to vector<64x1xf32>
    %cst_8 = arith.constant 1.600000e+01 : f32
    %18 = vector.broadcast %cst_8 : f32 to vector<64x1xf32>
    %19 = arith.divf %17, %18 : vector<64x1xf32>
    %20 = vector.broadcast %19 : vector<64x1xf32> to vector<64x16xf32>
    %21 = arith.subf %15, %20 : vector<64x16xf32>
    %22 = arith.mulf %21, %21 : vector<64x16xf32>
    %cst_9 = arith.constant dense<0.000000e+00> : vector<64xf32>
    %23 = vector.multi_reduction <add>, %22, %cst_9 [1] : vector<64x16xf32> to vector<64xf32>
    %24 = vector.shape_cast %23 : vector<64xf32> to vector<64x1xf32>
    %cst_10 = arith.constant 1.600000e+01 : f32
    %25 = vector.broadcast %cst_10 : f32 to vector<64x1xf32>
    %26 = arith.divf %24, %25 : vector<64x1xf32>
    %27 = vector.broadcast %19 : vector<64x1xf32> to vector<64x16xf32>
    %28 = arith.subf %15, %27 : vector<64x16xf32>
    %cst_11 = arith.constant 1.000000e-03 : f32
    %29 = vector.broadcast %cst_11 : f32 to vector<64x1xf32>
    %30 = arith.addf %26, %29 : vector<64x1xf32>
    %31 = math.rsqrt %30 : vector<64x1xf32>
    %32 = vector.broadcast %31 : vector<64x1xf32> to vector<64x16xf32>
    %33 = arith.mulf %28, %32 : vector<64x16xf32>
    %34 = vector.broadcast %11 : vector<1x16xf32> to vector<64x16xf32>
    %35 = arith.mulf %33, %34 : vector<64x16xf32>
    %36 = vector.broadcast %12 : vector<1x16xf32> to vector<64x16xf32>
    %37 = arith.addf %35, %36 : vector<64x16xf32>
    %38 = arith.truncf %37 : vector<64x16xf32> to vector<64x16xbf16>
    %c0_12 = arith.constant 0 : index
    %c0_13 = arith.constant 0 : index
    %39 = vector.load %arg3[%c0_12, %c0_13] : memref<16x64xbf16, #tpu.memory_space<vmem>>, vector<16x64xbf16>
    %cst_14 = arith.constant dense<0.000000e+00> : vector<64x64xf32>
    %40 = tpu.matmul %38, %39, %cst_14 {dimension_numbers = #tpu.dot_dimension_numbers<[1], [0], [0], [1], [0, 0, 1, 1], [], []>} : vector<64x16xbf16>, vector<16x64xbf16>, vector<64x64xf32> -> vector<64x64xf32>
    %41 = vector.extract_strided_slice %40 {offsets = [0, 0], sizes = [64, 32], strides = [1, 1]} : vector<64x64xf32> to vector<64x32xf32>
    %42 = tpu.transpose %41, [1, 0] : vector<64x32xf32> -> vector<32x64xf32>
    %43 = arith.truncf %42 : vector<32x64xf32> to vector<32x64xbf16>
    %44 = vector.extract_strided_slice %40 {offsets = [0, 32], sizes = [64, 32], strides = [1, 1]} : vector<64x64xf32> to vector<64x32xf32>
    %45 = arith.truncf %44 : vector<64x32xf32> to vector<64x32xbf16>
    %c0_15 = arith.constant 0 : index
    %c0_16 = arith.constant 0 : index
    %c0_17 = arith.constant 0 : index
    %46 = vector.load %arg2[%c0_15, %c0_16, %c0_17] : memref<1x8x32xf32, #tpu.memory_space<vmem>>, vector<1x8x32xf32>
    %47 = vector.shape_cast %46 : vector<1x8x32xf32> to vector<8x32xf32>
    %cst_18 = arith.constant dense<0.000000e+00> : vector<8xf32>
    %48 = vector.multi_reduction <add>, %47, %cst_18 [1] : vector<8x32xf32> to vector<8xf32>
    %49 = vector.shape_cast %48 : vector<8xf32> to vector<8x1xf32>
    %cst_19 = arith.constant 3.200000e+01 : f32
    %50 = vector.broadcast %cst_19 : f32 to vector<8x1xf32>
    %51 = arith.divf %49, %50 : vector<8x1xf32>
    %52 = vector.broadcast %51 : vector<8x1xf32> to vector<8x32xf32>
    %53 = arith.subf %47, %52 : vector<8x32xf32>
    %54 = arith.mulf %53, %53 : vector<8x32xf32>
    %cst_20 = arith.constant dense<0.000000e+00> : vector<8xf32>
    %55 = vector.multi_reduction <add>, %54, %cst_20 [1] : vector<8x32xf32> to vector<8xf32>
    %56 = vector.shape_cast %55 : vector<8xf32> to vector<8x1xf32>
    %cst_21 = arith.constant 3.200000e+01 : f32
    %57 = vector.broadcast %cst_21 : f32 to vector<8x1xf32>
    %58 = arith.divf %56, %57 : vector<8x1xf32>
    %59 = vector.broadcast %51 : vector<8x1xf32> to vector<8x32xf32>
    %60 = arith.subf %47, %59 : vector<8x32xf32>
    %cst_22 = arith.constant 1.000000e-03 : f32
    %61 = vector.broadcast %cst_22 : f32 to vector<8x1xf32>
    %62 = arith.addf %58, %61 : vector<8x1xf32>
    %63 = math.rsqrt %62 : vector<8x1xf32>
    %64 = vector.broadcast %63 : vector<8x1xf32> to vector<8x32xf32>
    %65 = arith.mulf %60, %64 : vector<8x32xf32>
    %66 = vector.broadcast %6 : vector<1x32xf32> to vector<8x32xf32>
    %67 = arith.mulf %65, %66 : vector<8x32xf32>
    %68 = vector.broadcast %7 : vector<1x32xf32> to vector<8x32xf32>
    %69 = arith.addf %67, %68 : vector<8x32xf32>
    %70 = arith.truncf %69 : vector<8x32xf32> to vector<8x32xbf16>
    %c0_23 = arith.constant 0 : index
    %c0_24 = arith.constant 0 : index
    %71 = vector.load %arg4[%c0_23, %c0_24] : memref<32x32xbf16, #tpu.memory_space<vmem>>, vector<32x32xbf16>
    %cst_25 = arith.constant dense<0.000000e+00> : vector<8x32xf32>
    %72 = tpu.matmul %70, %71, %cst_25 {dimension_numbers = #tpu.dot_dimension_numbers<[1], [0], [0], [1], [0, 0, 1, 1], [], []>} : vector<8x32xbf16>, vector<32x32xbf16>, vector<8x32xf32> -> vector<8x32xf32>
    %73 = arith.truncf %72 : vector<8x32xf32> to vector<8x32xbf16>
    %cst_26 = arith.constant dense<0.000000e+00> : vector<8x64xf32>
    %74 = tpu.matmul %73, %43, %cst_26 {dimension_numbers = #tpu.dot_dimension_numbers<[1], [0], [0], [1], [0, 0, 1, 1], [], []>} : vector<8x32xbf16>, vector<32x64xbf16>, vector<8x64xf32> -> vector<8x64xf32>
    %cst_27 = arith.constant dense<0xFF800000> : vector<64xf32>
    %75 = vector.multi_reduction <maximumf>, %74, %cst_27 [0] : vector<8x64xf32> to vector<64xf32>
    %76 = vector.shape_cast %75 : vector<64xf32> to vector<1x64xf32>
    %77 = vector.broadcast %76 : vector<1x64xf32> to vector<8x64xf32>
    %78 = arith.subf %74, %77 : vector<8x64xf32>
    %79 = math.exp %78 : vector<8x64xf32>
    %cst_28 = arith.constant dense<0.000000e+00> : vector<64xf32>
    %80 = vector.multi_reduction <add>, %79, %cst_28 [0] : vector<8x64xf32> to vector<64xf32>
    %81 = vector.shape_cast %80 : vector<64xf32> to vector<1x64xf32>
    %82 = tpu.reciprocal %81 {approx = true} : vector<1x64xf32> -> vector<1x64xf32>
    %83 = vector.broadcast %82 : vector<1x64xf32> to vector<8x64xf32>
    %84 = arith.mulf %79, %83 : vector<8x64xf32>
    %cst_29 = arith.constant 9.99999993E-9 : f32
    %85 = vector.broadcast %cst_29 : f32 to vector<8x64xf32>
    %86 = arith.addf %84, %85 : vector<8x64xf32>
    %cst_30 = arith.constant dense<0.000000e+00> : vector<8xf32>
    %87 = vector.multi_reduction <add>, %86, %cst_30 [1] : vector<8x64xf32> to vector<8xf32>
    %88 = vector.shape_cast %87 : vector<8xf32> to vector<8x1xf32>
    %89 = tpu.reciprocal %88 {approx = true} : vector<8x1xf32> -> vector<8x1xf32>
    %90 = vector.broadcast %89 : vector<8x1xf32> to vector<8x64xf32>
    %91 = arith.mulf %86, %90 : vector<8x64xf32>
    %92 = arith.truncf %91 : vector<8x64xf32> to vector<8x64xbf16>
    %cst_31 = arith.constant dense<0.000000e+00> : vector<8x32xf32>
    %93 = tpu.matmul %92, %45, %cst_31 {dimension_numbers = #tpu.dot_dimension_numbers<[1], [0], [0], [1], [0, 0, 1, 1], [], []>} : vector<8x64xbf16>, vector<64x32xbf16>, vector<8x32xf32> -> vector<8x32xf32>
    %94 = arith.truncf %93 : vector<8x32xf32> to vector<8x32xbf16>
    %c0_32 = arith.constant 0 : index
    %c0_33 = arith.constant 0 : index
    %95 = vector.load %arg5[%c0_32, %c0_33] : memref<32x96xbf16, #tpu.memory_space<vmem>>, vector<32x96xbf16>
    %cst_34 = arith.constant dense<0.000000e+00> : vector<8x96xf32>
    %96 = tpu.matmul %94, %95, %cst_34 {dimension_numbers = #tpu.dot_dimension_numbers<[1], [0], [0], [1], [0, 0, 1, 1], [], []>} : vector<8x32xbf16>, vector<32x96xbf16>, vector<8x96xf32> -> vector<8x96xf32>
    %97 = arith.truncf %47 : vector<8x32xf32> to vector<8x32xbf16>
    %c0_35 = arith.constant 0 : index
    %c0_36 = arith.constant 0 : index
    %98 = vector.load %arg6[%c0_35, %c0_36] : memref<32x96xbf16, #tpu.memory_space<vmem>>, vector<32x96xbf16>
    %cst_37 = arith.constant dense<0.000000e+00> : vector<8x96xf32>
    %99 = tpu.matmul %97, %98, %cst_37 {dimension_numbers = #tpu.dot_dimension_numbers<[1], [0], [0], [1], [0, 0, 1, 1], [], []>} : vector<8x32xbf16>, vector<32x96xbf16>, vector<8x96xf32> -> vector<8x96xf32>
    %100 = vector.extract_strided_slice %96 {offsets = [0, 0], sizes = [8, 32], strides = [1, 1]} : vector<8x96xf32> to vector<8x32xf32>
    %101 = vector.extract_strided_slice %99 {offsets = [0, 0], sizes = [8, 32], strides = [1, 1]} : vector<8x96xf32> to vector<8x32xf32>
    %102 = arith.addf %100, %101 : vector<8x32xf32>
    %103 = vector.broadcast %1 : vector<1x32xf32> to vector<8x32xf32>
    %104 = arith.addf %102, %103 : vector<8x32xf32>
    %105 = arith.negf %104 : vector<8x32xf32>
    %106 = math.exp %105 : vector<8x32xf32>
    %cst_38 = arith.constant 1.000000e+00 : f32
    %107 = vector.broadcast %cst_38 : f32 to vector<8x32xf32>
    %108 = arith.addf %107, %106 : vector<8x32xf32>
    %109 = arith.divf %107, %108 : vector<8x32xf32>
    %110 = vector.extract_strided_slice %96 {offsets = [0, 32], sizes = [8, 32], strides = [1, 1]} : vector<8x96xf32> to vector<8x32xf32>
    %111 = vector.extract_strided_slice %99 {offsets = [0, 32], sizes = [8, 32], strides = [1, 1]} : vector<8x96xf32> to vector<8x32xf32>
    %112 = arith.addf %110, %111 : vector<8x32xf32>
    %113 = vector.broadcast %2 : vector<1x32xf32> to vector<8x32xf32>
    %114 = arith.addf %112, %113 : vector<8x32xf32>
    %115 = arith.negf %114 : vector<8x32xf32>
    %116 = math.exp %115 : vector<8x32xf32>
    %cst_39 = arith.constant 1.000000e+00 : f32
    %117 = vector.broadcast %cst_39 : f32 to vector<8x32xf32>
    %118 = arith.addf %117, %116 : vector<8x32xf32>
    %119 = arith.divf %117, %118 : vector<8x32xf32>
    %120 = vector.extract_strided_slice %96 {offsets = [0, 64], sizes = [8, 32], strides = [1, 1]} : vector<8x96xf32> to vector<8x32xf32>
    %121 = vector.broadcast %3 : vector<1x32xf32> to vector<8x32xf32>
    %122 = arith.addf %120, %121 : vector<8x32xf32>
    %123 = vector.extract_strided_slice %99 {offsets = [0, 64], sizes = [8, 32], strides = [1, 1]} : vector<8x96xf32> to vector<8x32xf32>
    %124 = vector.broadcast %4 : vector<1x32xf32> to vector<8x32xf32>
    %125 = arith.addf %123, %124 : vector<8x32xf32>
    %126 = arith.mulf %109, %125 : vector<8x32xf32>
    %127 = arith.addf %122, %126 : vector<8x32xf32>
    %128 = math.tanh %127 : vector<8x32xf32>
    %cst_40 = arith.constant 1.000000e+00 : f32
    %129 = vector.broadcast %cst_40 : f32 to vector<8x32xf32>
    %130 = arith.subf %129, %119 : vector<8x32xf32>
    %131 = arith.mulf %130, %128 : vector<8x32xf32>
    %132 = arith.mulf %119, %47 : vector<8x32xf32>
    %133 = arith.addf %131, %132 : vector<8x32xf32>
    %cst_41 = arith.constant dense<0.000000e+00> : vector<8xf32>
    %134 = vector.multi_reduction <add>, %133, %cst_41 [1] : vector<8x32xf32> to vector<8xf32>
    %135 = vector.shape_cast %134 : vector<8xf32> to vector<8x1xf32>
    %cst_42 = arith.constant 3.200000e+01 : f32
    %136 = vector.broadcast %cst_42 : f32 to vector<8x1xf32>
    %137 = arith.divf %135, %136 : vector<8x1xf32>
    %138 = vector.broadcast %137 : vector<8x1xf32> to vector<8x32xf32>
    %139 = arith.subf %133, %138 : vector<8x32xf32>
    %140 = arith.mulf %139, %139 : vector<8x32xf32>
    %cst_43 = arith.constant dense<0.000000e+00> : vector<8xf32>
    %141 = vector.multi_reduction <add>, %140, %cst_43 [1] : vector<8x32xf32> to vector<8xf32>
    %142 = vector.shape_cast %141 : vector<8xf32> to vector<8x1xf32>
    %cst_44 = arith.constant 3.200000e+01 : f32
    %143 = vector.broadcast %cst_44 : f32 to vector<8x1xf32>
    %144 = arith.divf %142, %143 : vector<8x1xf32>
    %145 = vector.broadcast %137 : vector<8x1xf32> to vector<8x32xf32>
    %146 = arith.subf %133, %145 : vector<8x32xf32>
    %cst_45 = arith.constant 1.000000e-03 : f32
    %147 = vector.broadcast %cst_45 : f32 to vector<8x1xf32>
    %148 = arith.addf %144, %147 : vector<8x1xf32>
    %149 = math.rsqrt %148 : vector<8x1xf32>
    %150 = vector.broadcast %149 : vector<8x1xf32> to vector<8x32xf32>
    %151 = arith.mulf %146, %150 : vector<8x32xf32>
    %152 = vector.broadcast %8 : vector<1x32xf32> to vector<8x32xf32>
    %153 = arith.mulf %151, %152 : vector<8x32xf32>
    %154 = vector.broadcast %9 : vector<1x32xf32> to vector<8x32xf32>
    %155 = arith.addf %153, %154 : vector<8x32xf32>
    %156 = arith.truncf %155 : vector<8x32xf32> to vector<8x32xbf16>
    %c0_46 = arith.constant 0 : index
    %c0_47 = arith.constant 0 : index
    %157 = vector.load %arg7[%c0_46, %c0_47] : memref<32x64xbf16, #tpu.memory_space<vmem>>, vector<32x64xbf16>
    %cst_48 = arith.constant dense<0.000000e+00> : vector<8x64xf32>
    %158 = tpu.matmul %156, %157, %cst_48 {dimension_numbers = #tpu.dot_dimension_numbers<[1], [0], [0], [1], [0, 0, 1, 1], [], []>} : vector<8x32xbf16>, vector<32x64xbf16>, vector<8x64xf32> -> vector<8x64xf32>
    %159 = vector.broadcast %13 : vector<1x64xf32> to vector<8x64xf32>
    %160 = arith.addf %158, %159 : vector<8x64xf32>
    %cst_49 = arith.constant 0.000000e+00 : f32
    %161 = vector.broadcast %cst_49 : f32 to vector<8x64xf32>
    %162 = arith.maximumf %160, %161 : vector<8x64xf32>
    %163 = arith.truncf %162 : vector<8x64xf32> to vector<8x64xbf16>
    %c0_50 = arith.constant 0 : index
    %c0_51 = arith.constant 0 : index
    %164 = vector.load %arg8[%c0_50, %c0_51] : memref<64x32xbf16, #tpu.memory_space<vmem>>, vector<64x32xbf16>
    %cst_52 = arith.constant dense<0.000000e+00> : vector<8x32xf32>
    %165 = tpu.matmul %163, %164, %cst_52 {dimension_numbers = #tpu.dot_dimension_numbers<[1], [0], [0], [1], [0, 0, 1, 1], [], []>} : vector<8x64xbf16>, vector<64x32xbf16>, vector<8x32xf32> -> vector<8x32xf32>
    %166 = arith.addf %133, %165 : vector<8x32xf32>
    %167 = vector.broadcast %5 : vector<1x32xf32> to vector<8x32xf32>
    %168 = arith.addf %166, %167 : vector<8x32xf32>
    %cst_53 = arith.constant dense<0.000000e+00> : vector<8xf32>
    %169 = vector.multi_reduction <add>, %168, %cst_53 [1] : vector<8x32xf32> to vector<8xf32>
    %170 = vector.shape_cast %169 : vector<8xf32> to vector<8x1xf32>
    %cst_54 = arith.constant 3.200000e+01 : f32
    %171 = vector.broadcast %cst_54 : f32 to vector<8x1xf32>
    %172 = arith.divf %170, %171 : vector<8x1xf32>
    %173 = vector.broadcast %172 : vector<8x1xf32> to vector<8x32xf32>
    %174 = arith.subf %168, %173 : vector<8x32xf32>
    %175 = arith.mulf %174, %174 : vector<8x32xf32>
    %cst_55 = arith.constant dense<0.000000e+00> : vector<8xf32>
    %176 = vector.multi_reduction <add>, %175, %cst_55 [1] : vector<8x32xf32> to vector<8xf32>
    %177 = vector.shape_cast %176 : vector<8xf32> to vector<8x1xf32>
    %cst_56 = arith.constant 3.200000e+01 : f32
    %178 = vector.broadcast %cst_56 : f32 to vector<8x1xf32>
    %179 = arith.divf %177, %178 : vector<8x1xf32>
    %180 = vector.broadcast %172 : vector<8x1xf32> to vector<8x32xf32>
    %181 = arith.subf %168, %180 : vector<8x32xf32>
    %cst_57 = arith.constant 1.000000e-03 : f32
    %182 = vector.broadcast %cst_57 : f32 to vector<8x1xf32>
    %183 = arith.addf %179, %182 : vector<8x1xf32>
    %184 = math.rsqrt %183 : vector<8x1xf32>
    %185 = vector.broadcast %184 : vector<8x1xf32> to vector<8x32xf32>
    %186 = arith.mulf %181, %185 : vector<8x32xf32>
    %187 = vector.broadcast %6 : vector<1x32xf32> to vector<8x32xf32>
    %188 = arith.mulf %186, %187 : vector<8x32xf32>
    %189 = vector.broadcast %7 : vector<1x32xf32> to vector<8x32xf32>
    %190 = arith.addf %188, %189 : vector<8x32xf32>
    %191 = arith.truncf %190 : vector<8x32xf32> to vector<8x32xbf16>
    %c0_58 = arith.constant 0 : index
    %c0_59 = arith.constant 0 : index
    %192 = vector.load %arg4[%c0_58, %c0_59] : memref<32x32xbf16, #tpu.memory_space<vmem>>, vector<32x32xbf16>
    %cst_60 = arith.constant dense<0.000000e+00> : vector<8x32xf32>
    %193 = tpu.matmul %191, %192, %cst_60 {dimension_numbers = #tpu.dot_dimension_numbers<[1], [0], [0], [1], [0, 0, 1, 1], [], []>} : vector<8x32xbf16>, vector<32x32xbf16>, vector<8x32xf32> -> vector<8x32xf32>
    %194 = arith.truncf %193 : vector<8x32xf32> to vector<8x32xbf16>
    %cst_61 = arith.constant dense<0.000000e+00> : vector<8x64xf32>
    %195 = tpu.matmul %194, %43, %cst_61 {dimension_numbers = #tpu.dot_dimension_numbers<[1], [0], [0], [1], [0, 0, 1, 1], [], []>} : vector<8x32xbf16>, vector<32x64xbf16>, vector<8x64xf32> -> vector<8x64xf32>
    %cst_62 = arith.constant dense<0xFF800000> : vector<64xf32>
    %196 = vector.multi_reduction <maximumf>, %195, %cst_62 [0] : vector<8x64xf32> to vector<64xf32>
    %197 = vector.shape_cast %196 : vector<64xf32> to vector<1x64xf32>
    %198 = vector.broadcast %197 : vector<1x64xf32> to vector<8x64xf32>
    %199 = arith.subf %195, %198 : vector<8x64xf32>
    %200 = math.exp %199 : vector<8x64xf32>
    %cst_63 = arith.constant dense<0.000000e+00> : vector<64xf32>
    %201 = vector.multi_reduction <add>, %200, %cst_63 [0] : vector<8x64xf32> to vector<64xf32>
    %202 = vector.shape_cast %201 : vector<64xf32> to vector<1x64xf32>
    %203 = tpu.reciprocal %202 {approx = true} : vector<1x64xf32> -> vector<1x64xf32>
    %204 = vector.broadcast %203 : vector<1x64xf32> to vector<8x64xf32>
    %205 = arith.mulf %200, %204 : vector<8x64xf32>
    %cst_64 = arith.constant 9.99999993E-9 : f32
    %206 = vector.broadcast %cst_64 : f32 to vector<8x64xf32>
    %207 = arith.addf %205, %206 : vector<8x64xf32>
    %cst_65 = arith.constant dense<0.000000e+00> : vector<8xf32>
    %208 = vector.multi_reduction <add>, %207, %cst_65 [1] : vector<8x64xf32> to vector<8xf32>
    %209 = vector.shape_cast %208 : vector<8xf32> to vector<8x1xf32>
    %210 = tpu.reciprocal %209 {approx = true} : vector<8x1xf32> -> vector<8x1xf32>
    %211 = vector.broadcast %210 : vector<8x1xf32> to vector<8x64xf32>
    %212 = arith.mulf %207, %211 : vector<8x64xf32>
    %213 = arith.truncf %212 : vector<8x64xf32> to vector<8x64xbf16>
    %cst_66 = arith.constant dense<0.000000e+00> : vector<8x32xf32>
    %214 = tpu.matmul %213, %45, %cst_66 {dimension_numbers = #tpu.dot_dimension_numbers<[1], [0], [0], [1], [0, 0, 1, 1], [], []>} : vector<8x64xbf16>, vector<64x32xbf16>, vector<8x32xf32> -> vector<8x32xf32>
    %215 = arith.truncf %214 : vector<8x32xf32> to vector<8x32xbf16>
    %c0_67 = arith.constant 0 : index
    %c0_68 = arith.constant 0 : index
    %216 = vector.load %arg5[%c0_67, %c0_68] : memref<32x96xbf16, #tpu.memory_space<vmem>>, vector<32x96xbf16>
    %cst_69 = arith.constant dense<0.000000e+00> : vector<8x96xf32>
    %217 = tpu.matmul %215, %216, %cst_69 {dimension_numbers = #tpu.dot_dimension_numbers<[1], [0], [0], [1], [0, 0, 1, 1], [], []>} : vector<8x32xbf16>, vector<32x96xbf16>, vector<8x96xf32> -> vector<8x96xf32>
    %218 = arith.truncf %168 : vector<8x32xf32> to vector<8x32xbf16>
    %c0_70 = arith.constant 0 : index
    %c0_71 = arith.constant 0 : index
    %219 = vector.load %arg6[%c0_70, %c0_71] : memref<32x96xbf16, #tpu.memory_space<vmem>>, vector<32x96xbf16>
    %cst_72 = arith.constant dense<0.000000e+00> : vector<8x96xf32>
    %220 = tpu.matmul %218, %219, %cst_72 {dimension_numbers = #tpu.dot_dimension_numbers<[1], [0], [0], [1], [0, 0, 1, 1], [], []>} : vector<8x32xbf16>, vector<32x96xbf16>, vector<8x96xf32> -> vector<8x96xf32>
    %221 = vector.extract_strided_slice %217 {offsets = [0, 0], sizes = [8, 32], strides = [1, 1]} : vector<8x96xf32> to vector<8x32xf32>
    %222 = vector.extract_strided_slice %220 {offsets = [0, 0], sizes = [8, 32], strides = [1, 1]} : vector<8x96xf32> to vector<8x32xf32>
    %223 = arith.addf %221, %222 : vector<8x32xf32>
    %224 = vector.broadcast %1 : vector<1x32xf32> to vector<8x32xf32>
    %225 = arith.addf %223, %224 : vector<8x32xf32>
    %226 = arith.negf %225 : vector<8x32xf32>
    %227 = math.exp %226 : vector<8x32xf32>
    %cst_73 = arith.constant 1.000000e+00 : f32
    %228 = vector.broadcast %cst_73 : f32 to vector<8x32xf32>
    %229 = arith.addf %228, %227 : vector<8x32xf32>
    %230 = arith.divf %228, %229 : vector<8x32xf32>
    %231 = vector.extract_strided_slice %217 {offsets = [0, 32], sizes = [8, 32], strides = [1, 1]} : vector<8x96xf32> to vector<8x32xf32>
    %232 = vector.extract_strided_slice %220 {offsets = [0, 32], sizes = [8, 32], strides = [1, 1]} : vector<8x96xf32> to vector<8x32xf32>
    %233 = arith.addf %231, %232 : vector<8x32xf32>
    %234 = vector.broadcast %2 : vector<1x32xf32> to vector<8x32xf32>
    %235 = arith.addf %233, %234 : vector<8x32xf32>
    %236 = arith.negf %235 : vector<8x32xf32>
    %237 = math.exp %236 : vector<8x32xf32>
    %cst_74 = arith.constant 1.000000e+00 : f32
    %238 = vector.broadcast %cst_74 : f32 to vector<8x32xf32>
    %239 = arith.addf %238, %237 : vector<8x32xf32>
    %240 = arith.divf %238, %239 : vector<8x32xf32>
    %241 = vector.extract_strided_slice %217 {offsets = [0, 64], sizes = [8, 32], strides = [1, 1]} : vector<8x96xf32> to vector<8x32xf32>
    %242 = vector.broadcast %3 : vector<1x32xf32> to vector<8x32xf32>
    %243 = arith.addf %241, %242 : vector<8x32xf32>
    %244 = vector.extract_strided_slice %220 {offsets = [0, 64], sizes = [8, 32], strides = [1, 1]} : vector<8x96xf32> to vector<8x32xf32>
    %245 = vector.broadcast %4 : vector<1x32xf32> to vector<8x32xf32>
    %246 = arith.addf %244, %245 : vector<8x32xf32>
    %247 = arith.mulf %230, %246 : vector<8x32xf32>
    %248 = arith.addf %243, %247 : vector<8x32xf32>
    %249 = math.tanh %248 : vector<8x32xf32>
    %cst_75 = arith.constant 1.000000e+00 : f32
    %250 = vector.broadcast %cst_75 : f32 to vector<8x32xf32>
    %251 = arith.subf %250, %240 : vector<8x32xf32>
    %252 = arith.mulf %251, %249 : vector<8x32xf32>
    %253 = arith.mulf %240, %168 : vector<8x32xf32>
    %254 = arith.addf %252, %253 : vector<8x32xf32>
    %cst_76 = arith.constant dense<0.000000e+00> : vector<8xf32>
    %255 = vector.multi_reduction <add>, %254, %cst_76 [1] : vector<8x32xf32> to vector<8xf32>
    %256 = vector.shape_cast %255 : vector<8xf32> to vector<8x1xf32>
    %cst_77 = arith.constant 3.200000e+01 : f32
    %257 = vector.broadcast %cst_77 : f32 to vector<8x1xf32>
    %258 = arith.divf %256, %257 : vector<8x1xf32>
    %259 = vector.broadcast %258 : vector<8x1xf32> to vector<8x32xf32>
    %260 = arith.subf %254, %259 : vector<8x32xf32>
    %261 = arith.mulf %260, %260 : vector<8x32xf32>
    %cst_78 = arith.constant dense<0.000000e+00> : vector<8xf32>
    %262 = vector.multi_reduction <add>, %261, %cst_78 [1] : vector<8x32xf32> to vector<8xf32>
    %263 = vector.shape_cast %262 : vector<8xf32> to vector<8x1xf32>
    %cst_79 = arith.constant 3.200000e+01 : f32
    %264 = vector.broadcast %cst_79 : f32 to vector<8x1xf32>
    %265 = arith.divf %263, %264 : vector<8x1xf32>
    %266 = vector.broadcast %258 : vector<8x1xf32> to vector<8x32xf32>
    %267 = arith.subf %254, %266 : vector<8x32xf32>
    %cst_80 = arith.constant 1.000000e-03 : f32
    %268 = vector.broadcast %cst_80 : f32 to vector<8x1xf32>
    %269 = arith.addf %265, %268 : vector<8x1xf32>
    %270 = math.rsqrt %269 : vector<8x1xf32>
    %271 = vector.broadcast %270 : vector<8x1xf32> to vector<8x32xf32>
    %272 = arith.mulf %267, %271 : vector<8x32xf32>
    %273 = vector.broadcast %8 : vector<1x32xf32> to vector<8x32xf32>
    %274 = arith.mulf %272, %273 : vector<8x32xf32>
    %275 = vector.broadcast %9 : vector<1x32xf32> to vector<8x32xf32>
    %276 = arith.addf %274, %275 : vector<8x32xf32>
    %277 = arith.truncf %276 : vector<8x32xf32> to vector<8x32xbf16>
    %c0_81 = arith.constant 0 : index
    %c0_82 = arith.constant 0 : index
    %278 = vector.load %arg7[%c0_81, %c0_82] : memref<32x64xbf16, #tpu.memory_space<vmem>>, vector<32x64xbf16>
    %cst_83 = arith.constant dense<0.000000e+00> : vector<8x64xf32>
    %279 = tpu.matmul %277, %278, %cst_83 {dimension_numbers = #tpu.dot_dimension_numbers<[1], [0], [0], [1], [0, 0, 1, 1], [], []>} : vector<8x32xbf16>, vector<32x64xbf16>, vector<8x64xf32> -> vector<8x64xf32>
    %280 = vector.broadcast %13 : vector<1x64xf32> to vector<8x64xf32>
    %281 = arith.addf %279, %280 : vector<8x64xf32>
    %cst_84 = arith.constant 0.000000e+00 : f32
    %282 = vector.broadcast %cst_84 : f32 to vector<8x64xf32>
    %283 = arith.maximumf %281, %282 : vector<8x64xf32>
    %284 = arith.truncf %283 : vector<8x64xf32> to vector<8x64xbf16>
    %c0_85 = arith.constant 0 : index
    %c0_86 = arith.constant 0 : index
    %285 = vector.load %arg8[%c0_85, %c0_86] : memref<64x32xbf16, #tpu.memory_space<vmem>>, vector<64x32xbf16>
    %cst_87 = arith.constant dense<0.000000e+00> : vector<8x32xf32>
    %286 = tpu.matmul %284, %285, %cst_87 {dimension_numbers = #tpu.dot_dimension_numbers<[1], [0], [0], [1], [0, 0, 1, 1], [], []>} : vector<8x64xbf16>, vector<64x32xbf16>, vector<8x32xf32> -> vector<8x32xf32>
    %287 = arith.addf %254, %286 : vector<8x32xf32>
    %288 = vector.broadcast %5 : vector<1x32xf32> to vector<8x32xf32>
    %289 = arith.addf %287, %288 : vector<8x32xf32>
    %cst_88 = arith.constant dense<0.000000e+00> : vector<8xf32>
    %290 = vector.multi_reduction <add>, %289, %cst_88 [1] : vector<8x32xf32> to vector<8xf32>
    %291 = vector.shape_cast %290 : vector<8xf32> to vector<8x1xf32>
    %cst_89 = arith.constant 3.200000e+01 : f32
    %292 = vector.broadcast %cst_89 : f32 to vector<8x1xf32>
    %293 = arith.divf %291, %292 : vector<8x1xf32>
    %294 = vector.broadcast %293 : vector<8x1xf32> to vector<8x32xf32>
    %295 = arith.subf %289, %294 : vector<8x32xf32>
    %296 = arith.mulf %295, %295 : vector<8x32xf32>
    %cst_90 = arith.constant dense<0.000000e+00> : vector<8xf32>
    %297 = vector.multi_reduction <add>, %296, %cst_90 [1] : vector<8x32xf32> to vector<8xf32>
    %298 = vector.shape_cast %297 : vector<8xf32> to vector<8x1xf32>
    %cst_91 = arith.constant 3.200000e+01 : f32
    %299 = vector.broadcast %cst_91 : f32 to vector<8x1xf32>
    %300 = arith.divf %298, %299 : vector<8x1xf32>
    %301 = vector.broadcast %293 : vector<8x1xf32> to vector<8x32xf32>
    %302 = arith.subf %289, %301 : vector<8x32xf32>
    %cst_92 = arith.constant 1.000000e-03 : f32
    %303 = vector.broadcast %cst_92 : f32 to vector<8x1xf32>
    %304 = arith.addf %300, %303 : vector<8x1xf32>
    %305 = math.rsqrt %304 : vector<8x1xf32>
    %306 = vector.broadcast %305 : vector<8x1xf32> to vector<8x32xf32>
    %307 = arith.mulf %302, %306 : vector<8x32xf32>
    %308 = vector.broadcast %6 : vector<1x32xf32> to vector<8x32xf32>
    %309 = arith.mulf %307, %308 : vector<8x32xf32>
    %310 = vector.broadcast %7 : vector<1x32xf32> to vector<8x32xf32>
    %311 = arith.addf %309, %310 : vector<8x32xf32>
    %312 = arith.truncf %311 : vector<8x32xf32> to vector<8x32xbf16>
    %c0_93 = arith.constant 0 : index
    %c0_94 = arith.constant 0 : index
    %313 = vector.load %arg4[%c0_93, %c0_94] : memref<32x32xbf16, #tpu.memory_space<vmem>>, vector<32x32xbf16>
    %cst_95 = arith.constant dense<0.000000e+00> : vector<8x32xf32>
    %314 = tpu.matmul %312, %313, %cst_95 {dimension_numbers = #tpu.dot_dimension_numbers<[1], [0], [0], [1], [0, 0, 1, 1], [], []>} : vector<8x32xbf16>, vector<32x32xbf16>, vector<8x32xf32> -> vector<8x32xf32>
    %315 = arith.truncf %314 : vector<8x32xf32> to vector<8x32xbf16>
    %cst_96 = arith.constant dense<0.000000e+00> : vector<8x64xf32>
    %316 = tpu.matmul %315, %43, %cst_96 {dimension_numbers = #tpu.dot_dimension_numbers<[1], [0], [0], [1], [0, 0, 1, 1], [], []>} : vector<8x32xbf16>, vector<32x64xbf16>, vector<8x64xf32> -> vector<8x64xf32>
    %cst_97 = arith.constant dense<0xFF800000> : vector<64xf32>
    %317 = vector.multi_reduction <maximumf>, %316, %cst_97 [0] : vector<8x64xf32> to vector<64xf32>
    %318 = vector.shape_cast %317 : vector<64xf32> to vector<1x64xf32>
    %319 = vector.broadcast %318 : vector<1x64xf32> to vector<8x64xf32>
    %320 = arith.subf %316, %319 : vector<8x64xf32>
    %321 = math.exp %320 : vector<8x64xf32>
    %cst_98 = arith.constant dense<0.000000e+00> : vector<64xf32>
    %322 = vector.multi_reduction <add>, %321, %cst_98 [0] : vector<8x64xf32> to vector<64xf32>
    %323 = vector.shape_cast %322 : vector<64xf32> to vector<1x64xf32>
    %324 = tpu.reciprocal %323 {approx = true} : vector<1x64xf32> -> vector<1x64xf32>
    %325 = vector.broadcast %324 : vector<1x64xf32> to vector<8x64xf32>
    %326 = arith.mulf %321, %325 : vector<8x64xf32>
    %cst_99 = arith.constant 9.99999993E-9 : f32
    %327 = vector.broadcast %cst_99 : f32 to vector<8x64xf32>
    %328 = arith.addf %326, %327 : vector<8x64xf32>
    %cst_100 = arith.constant dense<0.000000e+00> : vector<8xf32>
    %329 = vector.multi_reduction <add>, %328, %cst_100 [1] : vector<8x64xf32> to vector<8xf32>
    %330 = vector.shape_cast %329 : vector<8xf32> to vector<8x1xf32>
    %331 = tpu.reciprocal %330 {approx = true} : vector<8x1xf32> -> vector<8x1xf32>
    %332 = vector.broadcast %331 : vector<8x1xf32> to vector<8x64xf32>
    %333 = arith.mulf %328, %332 : vector<8x64xf32>
    %334 = arith.truncf %333 : vector<8x64xf32> to vector<8x64xbf16>
    %cst_101 = arith.constant dense<0.000000e+00> : vector<8x32xf32>
    %335 = tpu.matmul %334, %45, %cst_101 {dimension_numbers = #tpu.dot_dimension_numbers<[1], [0], [0], [1], [0, 0, 1, 1], [], []>} : vector<8x64xbf16>, vector<64x32xbf16>, vector<8x32xf32> -> vector<8x32xf32>
    %336 = arith.truncf %335 : vector<8x32xf32> to vector<8x32xbf16>
    %c0_102 = arith.constant 0 : index
    %c0_103 = arith.constant 0 : index
    %337 = vector.load %arg5[%c0_102, %c0_103] : memref<32x96xbf16, #tpu.memory_space<vmem>>, vector<32x96xbf16>
    %cst_104 = arith.constant dense<0.000000e+00> : vector<8x96xf32>
    %338 = tpu.matmul %336, %337, %cst_104 {dimension_numbers = #tpu.dot_dimension_numbers<[1], [0], [0], [1], [0, 0, 1, 1], [], []>} : vector<8x32xbf16>, vector<32x96xbf16>, vector<8x96xf32> -> vector<8x96xf32>
    %339 = arith.truncf %289 : vector<8x32xf32> to vector<8x32xbf16>
    %c0_105 = arith.constant 0 : index
    %c0_106 = arith.constant 0 : index
    %340 = vector.load %arg6[%c0_105, %c0_106] : memref<32x96xbf16, #tpu.memory_space<vmem>>, vector<32x96xbf16>
    %cst_107 = arith.constant dense<0.000000e+00> : vector<8x96xf32>
    %341 = tpu.matmul %339, %340, %cst_107 {dimension_numbers = #tpu.dot_dimension_numbers<[1], [0], [0], [1], [0, 0, 1, 1], [], []>} : vector<8x32xbf16>, vector<32x96xbf16>, vector<8x96xf32> -> vector<8x96xf32>
    %342 = vector.extract_strided_slice %338 {offsets = [0, 0], sizes = [8, 32], strides = [1, 1]} : vector<8x96xf32> to vector<8x32xf32>
    %343 = vector.extract_strided_slice %341 {offsets = [0, 0], sizes = [8, 32], strides = [1, 1]} : vector<8x96xf32> to vector<8x32xf32>
    %344 = arith.addf %342, %343 : vector<8x32xf32>
    %345 = vector.broadcast %1 : vector<1x32xf32> to vector<8x32xf32>
    %346 = arith.addf %344, %345 : vector<8x32xf32>
    %347 = arith.negf %346 : vector<8x32xf32>
    %348 = math.exp %347 : vector<8x32xf32>
    %cst_108 = arith.constant 1.000000e+00 : f32
    %349 = vector.broadcast %cst_108 : f32 to vector<8x32xf32>
    %350 = arith.addf %349, %348 : vector<8x32xf32>
    %351 = arith.divf %349, %350 : vector<8x32xf32>
    %352 = vector.extract_strided_slice %338 {offsets = [0, 32], sizes = [8, 32], strides = [1, 1]} : vector<8x96xf32> to vector<8x32xf32>
    %353 = vector.extract_strided_slice %341 {offsets = [0, 32], sizes = [8, 32], strides = [1, 1]} : vector<8x96xf32> to vector<8x32xf32>
    %354 = arith.addf %352, %353 : vector<8x32xf32>
    %355 = vector.broadcast %2 : vector<1x32xf32> to vector<8x32xf32>
    %356 = arith.addf %354, %355 : vector<8x32xf32>
    %357 = arith.negf %356 : vector<8x32xf32>
    %358 = math.exp %357 : vector<8x32xf32>
    %cst_109 = arith.constant 1.000000e+00 : f32
    %359 = vector.broadcast %cst_109 : f32 to vector<8x32xf32>
    %360 = arith.addf %359, %358 : vector<8x32xf32>
    %361 = arith.divf %359, %360 : vector<8x32xf32>
    %362 = vector.extract_strided_slice %338 {offsets = [0, 64], sizes = [8, 32], strides = [1, 1]} : vector<8x96xf32> to vector<8x32xf32>
    %363 = vector.broadcast %3 : vector<1x32xf32> to vector<8x32xf32>
    %364 = arith.addf %362, %363 : vector<8x32xf32>
    %365 = vector.extract_strided_slice %341 {offsets = [0, 64], sizes = [8, 32], strides = [1, 1]} : vector<8x96xf32> to vector<8x32xf32>
    %366 = vector.broadcast %4 : vector<1x32xf32> to vector<8x32xf32>
    %367 = arith.addf %365, %366 : vector<8x32xf32>
    %368 = arith.mulf %351, %367 : vector<8x32xf32>
    %369 = arith.addf %364, %368 : vector<8x32xf32>
    %370 = math.tanh %369 : vector<8x32xf32>
    %cst_110 = arith.constant 1.000000e+00 : f32
    %371 = vector.broadcast %cst_110 : f32 to vector<8x32xf32>
    %372 = arith.subf %371, %361 : vector<8x32xf32>
    %373 = arith.mulf %372, %370 : vector<8x32xf32>
    %374 = arith.mulf %361, %289 : vector<8x32xf32>
    %375 = arith.addf %373, %374 : vector<8x32xf32>
    %cst_111 = arith.constant dense<0.000000e+00> : vector<8xf32>
    %376 = vector.multi_reduction <add>, %375, %cst_111 [1] : vector<8x32xf32> to vector<8xf32>
    %377 = vector.shape_cast %376 : vector<8xf32> to vector<8x1xf32>
    %cst_112 = arith.constant 3.200000e+01 : f32
    %378 = vector.broadcast %cst_112 : f32 to vector<8x1xf32>
    %379 = arith.divf %377, %378 : vector<8x1xf32>
    %380 = vector.broadcast %379 : vector<8x1xf32> to vector<8x32xf32>
    %381 = arith.subf %375, %380 : vector<8x32xf32>
    %382 = arith.mulf %381, %381 : vector<8x32xf32>
    %cst_113 = arith.constant dense<0.000000e+00> : vector<8xf32>
    %383 = vector.multi_reduction <add>, %382, %cst_113 [1] : vector<8x32xf32> to vector<8xf32>
    %384 = vector.shape_cast %383 : vector<8xf32> to vector<8x1xf32>
    %cst_114 = arith.constant 3.200000e+01 : f32
    %385 = vector.broadcast %cst_114 : f32 to vector<8x1xf32>
    %386 = arith.divf %384, %385 : vector<8x1xf32>
    %387 = vector.broadcast %379 : vector<8x1xf32> to vector<8x32xf32>
    %388 = arith.subf %375, %387 : vector<8x32xf32>
    %cst_115 = arith.constant 1.000000e-03 : f32
    %389 = vector.broadcast %cst_115 : f32 to vector<8x1xf32>
    %390 = arith.addf %386, %389 : vector<8x1xf32>
    %391 = math.rsqrt %390 : vector<8x1xf32>
    %392 = vector.broadcast %391 : vector<8x1xf32> to vector<8x32xf32>
    %393 = arith.mulf %388, %392 : vector<8x32xf32>
    %394 = vector.broadcast %8 : vector<1x32xf32> to vector<8x32xf32>
    %395 = arith.mulf %393, %394 : vector<8x32xf32>
    %396 = vector.broadcast %9 : vector<1x32xf32> to vector<8x32xf32>
    %397 = arith.addf %395, %396 : vector<8x32xf32>
    %398 = arith.truncf %397 : vector<8x32xf32> to vector<8x32xbf16>
    %c0_116 = arith.constant 0 : index
    %c0_117 = arith.constant 0 : index
    %399 = vector.load %arg7[%c0_116, %c0_117] : memref<32x64xbf16, #tpu.memory_space<vmem>>, vector<32x64xbf16>
    %cst_118 = arith.constant dense<0.000000e+00> : vector<8x64xf32>
    %400 = tpu.matmul %398, %399, %cst_118 {dimension_numbers = #tpu.dot_dimension_numbers<[1], [0], [0], [1], [0, 0, 1, 1], [], []>} : vector<8x32xbf16>, vector<32x64xbf16>, vector<8x64xf32> -> vector<8x64xf32>
    %401 = vector.broadcast %13 : vector<1x64xf32> to vector<8x64xf32>
    %402 = arith.addf %400, %401 : vector<8x64xf32>
    %cst_119 = arith.constant 0.000000e+00 : f32
    %403 = vector.broadcast %cst_119 : f32 to vector<8x64xf32>
    %404 = arith.maximumf %402, %403 : vector<8x64xf32>
    %405 = arith.truncf %404 : vector<8x64xf32> to vector<8x64xbf16>
    %c0_120 = arith.constant 0 : index
    %c0_121 = arith.constant 0 : index
    %406 = vector.load %arg8[%c0_120, %c0_121] : memref<64x32xbf16, #tpu.memory_space<vmem>>, vector<64x32xbf16>
    %cst_122 = arith.constant dense<0.000000e+00> : vector<8x32xf32>
    %407 = tpu.matmul %405, %406, %cst_122 {dimension_numbers = #tpu.dot_dimension_numbers<[1], [0], [0], [1], [0, 0, 1, 1], [], []>} : vector<8x64xbf16>, vector<64x32xbf16>, vector<8x32xf32> -> vector<8x32xf32>
    %408 = arith.addf %375, %407 : vector<8x32xf32>
    %409 = vector.broadcast %5 : vector<1x32xf32> to vector<8x32xf32>
    %410 = arith.addf %408, %409 : vector<8x32xf32>
    %c0_123 = arith.constant 0 : index
    %c0_124 = arith.constant 0 : index
    %c0_125 = arith.constant 0 : index
    %411 = vector.load %arg12[%c0_123, %c0_124, %c0_125] : memref<1x8x32xf32, #tpu.memory_space<vmem>>, vector<1x8x32xf32>
    %412 = vector.shape_cast %411 : vector<1x8x32xf32> to vector<8x32xf32>
    %413 = vector.shape_cast %410 : vector<8x32xf32> to vector<1x8x32xf32>
    tpu.vector_store %arg12[%c0_123, %c0_124, %c0_125], %413 {strides = array<i32>} : memref<1x8x32xf32, #tpu.memory_space<vmem>>, vector<1x8x32xf32>,
    return
  }
  func.func @transform_0(%arg0: i32) -> (i32, i32, i32) {
    %c0_i32 = arith.constant 0 : i32
    %c0_i32_0 = arith.constant 0 : i32
    %c0_i32_1 = arith.constant 0 : i32
    return %arg0, %c0_i32, %c0_i32_0 : i32, i32, i32
  }
  func.func @transform_1(%arg0: i32) -> (i32, i32, i32) {
    %c0_i32 = arith.constant 0 : i32
    %c0_i32_0 = arith.constant 0 : i32
    %c0_i32_1 = arith.constant 0 : i32
    return %arg0, %c0_i32, %c0_i32_0 : i32, i32, i32
  }
  func.func @transform_2(%arg0: i32) -> (i32, i32) {
    %c0_i32 = arith.constant 0 : i32
    %c0_i32_0 = arith.constant 0 : i32
    %c0_i32_1 = arith.constant 0 : i32
    return %c0_i32, %c0_i32_0 : i32, i32
  }
  func.func @transform_3(%arg0: i32) -> (i32, i32) {
    %c0_i32 = arith.constant 0 : i32
    %c0_i32_0 = arith.constant 0 : i32
    %c0_i32_1 = arith.constant 0 : i32
    return %c0_i32, %c0_i32_0 : i32, i32
  }
  func.func @transform_4(%arg0: i32) -> (i32, i32) {
    %c0_i32 = arith.constant 0 : i32
    %c0_i32_0 = arith.constant 0 : i32
    %c0_i32_1 = arith.constant 0 : i32
    return %c0_i32, %c0_i32_0 : i32, i32
  }
  func.func @transform_5(%arg0: i32) -> (i32, i32) {
    %c0_i32 = arith.constant 0 : i32
    %c0_i32_0 = arith.constant 0 : i32
    %c0_i32_1 = arith.constant 0 : i32
    return %c0_i32, %c0_i32_0 : i32, i32
  }
  func.func @transform_6(%arg0: i32) -> (i32, i32) {
    %c0_i32 = arith.constant 0 : i32
    %c0_i32_0 = arith.constant 0 : i32
    %c0_i32_1 = arith.constant 0 : i32
    return %c0_i32, %c0_i32_0 : i32, i32
  }
  func.func @transform_7(%arg0: i32) -> (i32, i32) {
    %c0_i32 = arith.constant 0 : i32
    %c0_i32_0 = arith.constant 0 : i32
    %c0_i32_1 = arith.constant 0 : i32
    return %c0_i32, %c0_i32_0 : i32, i32
  }
  func.func @transform_8(%arg0: i32) -> (i32, i32) {
    %c0_i32 = arith.constant 0 : i32
    %c0_i32_0 = arith.constant 0 : i32
    %c0_i32_1 = arith.constant 0 : i32
    return %c0_i32, %c0_i32_0 : i32, i32
  }
  func.func @transform_9(%arg0: i32) -> (i32, i32) {
    %c0_i32 = arith.constant 0 : i32
    %c0_i32_0 = arith.constant 0 : i32
    %c0_i32_1 = arith.constant 0 : i32
    return %c0_i32, %c0_i32_0 : i32, i32
  }
  func.func @transform_10(%arg0: i32) -> (i32, i32) {
    %c0_i32 = arith.constant 0 : i32
    %c0_i32_0 = arith.constant 0 : i32
    %c0_i32_1 = arith.constant 0 : i32
    return %c0_i32, %c0_i32_0 : i32, i32
  }
  func.func @transform_11(%arg0: i32) -> (i32, i32, i32) {
    %c0_i32 = arith.constant 0 : i32
    %c0_i32_0 = arith.constant 0 : i32
    %c0_i32_1 = arith.constant 0 : i32
    return %arg0, %c0_i32, %c0_i32_0 : i32, i32, i32
  }
}

</mosaic_0001>

<bundles_post_ra>
// kernel: tpu_custom_call.1
= control target key start
LH: loop header
LB: loop body
LE: loop exit
PB: predicated region body
PF: predicated region fallthrough
CT: control target
= control target key end

     0   :  { %16 = vsyncpa [#allocation3], 0  ;;  %s3450_s0 = inlined_call_operand.vmem [shape: f32[2,64,16], index: 0, kind: input, shape index: {}]   ;;  %s3451_s1 = inlined_call_operand.vmem [shape: f32[2,8,32], index: 1, kind: input, shape index: {}]   ;;  %s3452_s2 = inlined_call_operand.vmem [shape: bf16[16,64], index: 2, kind: input, shape index: {}]   ;;  %s3453_s3 = inlined_call_operand.vmem [shape: bf16[32,32], index: 3, kind: input, shape index: {}]   ;;  %s3454_s4 = inlined_call_operand.vmem [shape: bf16[32,96], index: 4, kind: input, shape index: {}]   ;;  %s3455_s5 = inlined_call_operand.vmem [shape: bf16[32,96], index: 5, kind: input, shape index: {}]   ;;  %s3456_s6 = inlined_call_operand.vmem [shape: bf16[32,64], index: 6, kind: input, shape index: {}]   ;;  %s3457_s7 = inlined_call_operand.vmem [shape: bf16[64,32], index: 7, kind: input, shape index: {}]   ;;  %s3458_s8 = inlined_call_operand.vmem [shape: f32[9,32], index: 8, kind: input, shape index: {}]   ;;  %s3459_s9 = inlined_call_operand.vmem [shape: f32[2,16], index: 9, kind: input, shape index: {}]   ;;  %s3460_s10 = inlined_call_operand.vmem [shape: f32[1,64], index: 10, kind: input, shape index: {}]   ;;  %s3461_s11 = inlined_call_operand.hbm [shape: f32[2,8,32], index: 11, kind: output, shape index: {}]  }
   0x1   :  { %18 = vsyncpa [#allocation3 + $0x1], 0  ;;  %s2841_s17 = smov 0   ;;  %s2843_s18 = smov 0  }
   0x2   :  { %s2845_s19 = smov 0   ;;  %s2847_s20 = smov 0  }
   0x3 LB: > { %s2862_s21 = sadd.s32 4294967295, %s2773_s20   ;;  %s2235_s22 = sadd.s32 4294967294, %s2773_s20   ;;  %s2773_s20 = sphi %s2847_s20, %s3467_s20   ;;  %s2769_s19 = sphi %s2845_s19, %s3466_s19   ;;  %s2765_s18 = sphi %s2843_s18, %s3465_s18   ;;  %s2761_s17 = sphi %s2841_s17, %s3464_s17  }
   0x4   : > { %s2866_s23 = sadd.s32 1, %s2773_s20   ;;  %s272_s24 = sadd.s32 1, %s2769_s19 }
   0x5   : > { %s269_s25 = ssub.s32 %s2773_s20, %s2866_s23  ;;  %p282_p0 = scmp.ne.s32.totalorder %s2769_s19, %s2765_s18 }
   0x6   : > { %p270_p1 = scmp.eq.s32.totalorder %s269_s25, 0  ;;  %p283_p2 = scmp.eq.s32.totalorder %s2862_s21, 1 }
   0x7   : > { %p288_p3 = scmp.ne.s32.totalorder %s2765_s18, %s2761_s17  ;;  %p289_p4 = scmp.eq.s32.totalorder %s2235_s22, 1 }
   0x8   : > { %s2877_s26 = scalar_select %p270_p1, %s2769_s19, %s272_s24  }
   0x9   : > { %p2879_p5 = por %p283_p2, %p282_p0  ;;  %p2883_p6 = por %p289_p4, %p288_p3 }
   0xa   : > { %p2238_p7 = scmp.ge.s32.totalorder %s2773_s20, 1  ;;  %p349_p8 = scmp.lt.s32.totalorder %s2773_s20, 3 }
   0xc   : > { %p350_p9 = pnand %p2238_p7, %p349_p8 }
   0xd   : > { %p393_p10 = scmp.lt.s32.totalorder (!%p350_p9), %s2862_s21, 1  ;;  %vm415_vm0 = vcmask (!%p350_p9), 130048   ;;  %vm673_vm1 = vcmask (!%p350_p9), 261120   ;;  %v2620_v63 = vld [vmem:[%s3452_s2] sm:$0xff] (!%p350_p9)   ;;  %vm2776_vm2 = vmmov (!%p350_p9), 0   ;;  %s2777_s25 = smov (!%p350_p9), 96  }
   0xe   : > { %353 = sbr.rel (%p350_p9) target bundleno = 9895 (0x26a7), region = 64  ;;  %2374 = vmatprep.subr.bf16.mxu0 (!%p350_p9), %v2620_v63  ;;  %vm802_vm3 = vcmask (!%p350_p9), 523264  }
   0xf   : > { %2375 = vmatpush3.bf16.msra.mxu0 (!%p350_p9), %v2620_v63  ;;  %v2996_v63 = vld [vmem:[%s3458_s8] sm:$0xff] (!%p350_p9) }
  0x15   : > { %s394_s29 = scalar_select %p393_p10, %s2862_s21, 1 }
  0x17   : > { %s2293_s30 = sshll.u32 %s394_s29, 6  ;;  %s2242_s15 = sshll.u32 %s394_s29, 3 }
  0x18   : > { %s397_s14 = scalar_lea.vmem %s3450_s0, %s2293_s30  ;;  %s401_s24 = scalar_lea.vmem %s3451_s1, %s2242_s15 }
  0x19   : > { %v407_v0 = vld [vmem:[%s397_s14] sm:$0xff]  ;;  %v409_v1 = vld [vmem:[%s397_s14 + $0x10] sm:$0xff]  ;;  %v408_v2 = vld [vmem:[%s397_s14 + $0x8] sm:$0xff]  ;;  %s2779_s29 = smov 32   ;;  %s2290_s30 = sshll.u32 %s2862_s21, 7 }
  0x1a   : > { %v416_v3 = vsel %vm415_vm0, %v407_v0, 0.0  ;;  %v422_v4 = vsel %vm415_vm0, %v409_v1, 0.0  ;;  %v410_v5 = vld [vmem:[%s397_s14 + $0x18] sm:$0xff]  ;;  %v419_v6 = vsel %vm415_vm0, %v408_v2, 0.0  ;;  %v411_v8 = vld [vmem:[%s397_s14 + $0x20] sm:$0xff]  ;;  %v412_v9 = vld [vmem:[%s397_s14 + $0x28] sm:$0xff]  ;;  %s3407_s22 = scalar_lea.hbm %s3461_s11, %s2290_s30 }
  0x1b   : > { %417 = vadd.xlane.f32.xlu0 %v416_v3  ;;  %423 = vadd.xlane.f32.xlu1 %v422_v4  ;;  %v425_v7 = vsel %vm415_vm0, %v410_v5, 0.0  ;;  %v428_v10 = vsel %vm415_vm0, %v411_v8, 0.0  ;;  %v431_v11 = vsel %vm415_vm0, %v412_v9, 0.0  ;;  %v413_v12 = vld [vmem:[%s397_s14 + $0x30] sm:$0xff]  ;;  %v414_v13 = vld [vmem:[%s397_s14 + $0x38] sm:$0xff]  ;;  %v2905_v16 = vld [vmem:[%s401_s24] sm:$0xff] }
  0x1c   : > { %v434_v14 = vsel %vm415_vm0, %v413_v12, 0.0  ;;  %v437_v15 = vsel %vm415_vm0, %v414_v13, 0.0  ;;  %v674_v17 = vsel %vm673_vm1, %v2905_v16, 0.0  ;;  %s2778_s14 = smov 64   ;;  %s2780_s21 = smov [#allocation2]  }
  0x1f   : > { %420 = vadd.xlane.f32.xlu0 %v419_v6  ;;  %426 = vadd.xlane.f32.xlu1 %v425_v7 }
  0x23   : > { %429 = vadd.xlane.f32.xlu0 %v428_v10  ;;  %432 = vadd.xlane.f32.xlu1 %v431_v11 }
  0x27   : > { %435 = vadd.xlane.f32.xlu0 %v434_v14  ;;  %438 = vadd.xlane.f32.xlu1 %v437_v15 }
  0x2b   : > { %675 = vadd.xlane.f32.xlu0 %v674_v17 }
  0xa8   : > { %v418_v18 = vpop.xlane.xlu0 %417  ;;  %v424_v19 = vpop.xlane.xlu1 %423 }
  0xa9   : > { %v441_v20 = vmul.f32 0.0625, %v418_v18  ;;  %v443_v21 = vmul.f32 0.0625, %v424_v19 }
  0xab   : > { %v2909_v22 = vsub.f32 %v407_v0, %v441_v20  ;;  %v2911_v23 = vsub.f32 %v409_v1, %v443_v21  ;;  %v2961_v0 = vld [vmem:[%s3453_s3] sm:$0xff]   ;;  %v2775_v1 = vmov 0.0  }
  0xac   : > { %v421_v24 = vpop.xlane.xlu0 %420  ;;  %v427_v25 = vpop.xlane.xlu1 %426  ;;  %2384 = vmatprep.subr.bf16.mxu1 %v2775_v1  ;;  %2400 = vmatprep.subr.bf16.mxu0 %v2775_v1 }
  0xad   : > { %v442_v26 = vmul.f32 0.0625, %v421_v24  ;;  %v444_v27 = vmul.f32 0.0625, %v427_v25  ;;  %v457_v28 = vmul.f32 %v2909_v22, %v2909_v22  ;;  %v459_v29 = vmul.f32 %v2911_v23, %v2911_v23  ;;  %2385 = vmatpush3.bf16.msra.mxu1 %v2961_v0  ;;  %2388 = vmatprep.mubr.msk.bf16.mxu1 %vm2776_vm2, %v2775_v1 }
  0xae   : > { %2386 = vmatprep.subr.bf16.mxu1 %v2775_v1 }
  0xaf   : > { %v2917_v30 = vsub.f32 %v408_v2, %v442_v26  ;;  %v2919_v31 = vsub.f32 %v410_v5, %v444_v27  ;;  %v465_v32 = vsel %vm415_vm0, %v457_v28, 0.0  ;;  %v471_v35 = vsel %vm415_vm0, %v459_v29, 0.0  ;;  %v2970_v2 = vld [vmem:[%s3453_s3 + $0x8] sm:$0xff]   ;;  %v405_v28 = vld [vmem:[%s3459_s9] sm:$0x3] }
  0xb0   : > { %466 = vadd.xlane.f32.xlu1 %v465_v32  ;;  %v430_v33 = vpop.xlane.xlu0 %429  ;;  %v433_v34 = vpop.xlane.xlu1 %432 }
  0xb1   : > { %v445_v36 = vmul.f32 0.0625, %v430_v33  ;;  %v446_v37 = vmul.f32 0.0625, %v433_v34  ;;  %v458_v38 = vmul.f32 %v2917_v30, %v2917_v30  ;;  %v460_v39 = vmul.f32 %v2919_v31, %v2919_v31  ;;  %2387 = vmatpush3.bf16.msra.mxu1 %v2970_v2 }
  0xb2   : > { %2392 = vmatprep.subr.bf16.mxu1 %v2775_v1 }
  0xb3   : > { %v2927_v40 = vsub.f32 %v411_v8, %v445_v36  ;;  %v2929_v41 = vsub.f32 %v412_v9, %v446_v37  ;;  %v468_v42 = vsel %vm415_vm0, %v458_v38, 0.0  ;;  %v474_v45 = vsel %vm415_vm0, %v460_v39, 0.0 }
  0xb4   : > { %472 = vadd.xlane.f32.xlu1 %v471_v35  ;;  %469 = vadd.xlane.f32.xlu0 %v468_v42  ;;  %v436_v43 = vpop.xlane.xlu0 %435  ;;  %v439_v44 = vpop.xlane.xlu1 %438  ;;  %v521_v8 = vlaneseq }
  0xb5   : > { %v447_v46 = vmul.f32 0.0625, %v436_v43  ;;  %v448_v47 = vmul.f32 0.0625, %v439_v44  ;;  %v461_v48 = vmul.f32 %v2927_v40, %v2927_v40  ;;  %v462_v49 = vmul.f32 %v2929_v41, %v2929_v41 }
  0xb6   : > { %v2976_v15 = vshrl.u32 %v521_v8, 7 }
  0xb7   : > { %v2937_v50 = vsub.f32 %v413_v12, %v447_v46  ;;  %v2939_v51 = vsub.f32 %v414_v13, %v448_v47  ;;  %v477_v52 = vsel %vm415_vm0, %v461_v48, 0.0  ;;  %v480_v55 = vsel %vm415_vm0, %v462_v49, 0.0 }
  0xb8   : > { %475 = vadd.xlane.f32.xlu0 %v474_v45  ;;  %478 = vadd.xlane.f32.xlu1 %v477_v52  ;;  %v676_v53 = vpop.xlane.xlu0 %675  ;;  %v523_v25 = vsub.s32 0, %v2976_v15  ;;  %v535_v37 = vsub.s32 1, %v2976_v15 }
  0xb9   : > { %v678_v54 = vmul.f32 0.03125, %v676_v53  ;;  %v463_v56 = vmul.f32 %v2937_v50, %v2937_v50  ;;  %v464_v57 = vmul.f32 %v2939_v51, %v2939_v51 }
  0xba   : > { %v524_v36 = vrot.slane %v405_v28, %v523_v25  ;;  %v536_v52 = vrot.slane %v405_v28, %v535_v37 }
  0xbb   : > { %v2948_v58 = vsub.f32 %v2905_v16, %v678_v54  ;;  %v483_v59 = vsel %vm415_vm0, %v463_v56, 0.0  ;;  %v486_v60 = vsel %vm415_vm0, %v464_v57, 0.0 }
  0xbc   : > { %481 = vadd.xlane.f32.xlu0 %v480_v55  ;;  %484 = vadd.xlane.f32.xlu1 %v483_v59 }
  0xbd   : > { %v680_v61 = vmul.f32 %v2948_v58, %v2948_v58 }
  0xbf   : > { %v681_v62 = vsel %vm673_vm1, %v680_v61, 0.0 }
  0xc0   : > { %487 = vadd.xlane.f32.xlu0 %v486_v60  ;;  %682 = vadd.xlane.f32.xlu1 %v681_v62 }
 0x13d   : > { %v467_v3 = vpop.xlane.xlu1 %466 }
 0x13e   : > { %v489_v4 = vmul.f32 0.0625, %v467_v3 }
 0x140   : > { %v497_v5 = vadd.f32 0.001, %v489_v4 }
 0x141   : > { %v473_v6 = vpop.xlane.xlu1 %472  ;;  %v470_v7 = vpop.xlane.xlu0 %469 }
 0x142   : > { %2633 = vrsqrt.f32 %v497_v5  ;;  %v491_v9 = vmul.f32 0.0625, %v473_v6  ;;  %v490_v10 = vmul.f32 0.0625, %v470_v7  ;;  %v695_v5 = vsub.s32 6, %v2976_v15 }
 0x144   : > { %v499_v11 = vadd.f32 0.001, %v491_v9  ;;  %v498_v12 = vadd.f32 0.001, %v490_v10 }
 0x145   : > { %v479_v13 = vpop.xlane.xlu1 %478  ;;  %v476_v14 = vpop.xlane.xlu0 %475 }
 0x146   : > { %2635 = vrsqrt.f32 %v499_v11  ;;  %v493_v17 = vmul.f32 0.0625, %v479_v13  ;;  %v492_v18 = vmul.f32 0.0625, %v476_v14  ;;  %v3007_v14 = vrot.slane %v2996_v63, %v695_v5 }
 0x147   : > { %2637 = vrsqrt.f32 %v498_v12 }
 0x148   : > { %v501_v19 = vadd.f32 0.001, %v493_v17  ;;  %v500_v20 = vadd.f32 0.001, %v492_v18 }
 0x149   : > { %v485_v21 = vpop.xlane.xlu1 %484  ;;  %v482_v24 = vpop.xlane.xlu0 %481 }
 0x14a   : > { %2639 = vrsqrt.f32 %v501_v19  ;;  %v495_v26 = vmul.f32 0.0625, %v485_v21  ;;  %v494_v27 = vmul.f32 0.0625, %v482_v24 }
 0x14b   : > { %2641 = vrsqrt.f32 %v500_v20 }
 0x14c   : > { %v2634_v29 = vpop.eup %2633  ;;  %v503_v32 = vadd.f32 0.001, %v495_v26  ;;  %v502_v33 = vadd.f32 0.001, %v494_v27 }
 0x14d   : > { %v683_v34 = vpop.xlane.xlu1 %682  ;;  %v488_v35 = vpop.xlane.xlu0 %487  ;;  %v513_v42 = vmul.f32 %v2634_v29, %v2909_v22 }
 0x14e   : > { %2643 = vrsqrt.f32 %v503_v32  ;;  %v684_v38 = vmul.f32 0.03125, %v683_v34  ;;  %v496_v39 = vmul.f32 0.0625, %v488_v35 }
 0x14f   : > { %2645 = vrsqrt.f32 %v502_v33  ;;  %v525_v49 = vmul.f32 %v524_v36, %v513_v42 }
 0x150   : > { %v2636_v43 = vpop.eup %2635  ;;  %v685_v44 = vadd.f32 0.001, %v684_v38  ;;  %v504_v45 = vadd.f32 0.001, %v496_v39 }
 0x151   : > { %v2638_v46 = vpop.eup %2637  ;;  %v515_v47 = vmul.f32 %v2636_v43, %v2911_v23  ;;  %v537_v59 = vadd.f32 %v536_v52, %v525_v49  ;;  %v690_v23 = vsub.s32 5, %v2976_v15 }
 0x152   : > { %2647 = vrsqrt.f32 %v685_v44  ;;  %v514_v48 = vmul.f32 %v2638_v46, %v2917_v30 }
 0x153   : > { %2649 = vrsqrt.f32 %v504_v45  ;;  %v527_v56 = vmul.f32 %v524_v36, %v515_v47  ;;  %v3003_v8 = vrot.slane %v2996_v63, %v690_v23 }
 0x154   : > { %v2640_v53 = vpop.eup %2639  ;;  %v526_v54 = vmul.f32 %v524_v36, %v514_v48 }
 0x155   : > { %v2642_v55 = vpop.eup %2641  ;;  %v517_v22 = vmul.f32 %v2640_v53, %v2927_v40  ;;  %v539_v4 = vadd.f32 %v536_v52, %v527_v56 }
 0x156   : > { %v516_v57 = vmul.f32 %v2642_v55, %v2919_v31  ;;  %v538_v60 = vadd.f32 %v536_v52, %v526_v54 }
 0x157   : > { %v529_v7 = vmul.f32 %v524_v36, %v517_v22 }
 0x158   : > { %v2644_v61 = vpop.eup %2643  ;;  %v545_v62 = vpack.c.bf16 %v538_v60, %v537_v59  ;;  %v528_v30 = vmul.f32 %v524_v36, %v516_v57 }
 0x159   : > { %v2646_v3 = vpop.eup %2645  ;;  %v519_v40 = vmul.f32 %v2644_v61, %v2937_v50 }
 0x15a   : > { %v518_v31 = vmul.f32 %v2646_v3, %v2929_v41  ;;  %2376 = vmatprep.mubr.msk.bf16.mxu0 %vm415_vm0, %v545_v62  ;;  %v540_v6 = vadd.f32 %v536_v52, %v528_v30  ;;  %v541_v41 = vadd.f32 %v536_v52, %v529_v7 }
 0x15b   : > { %v531_v18 = vmul.f32 %v524_v36, %v519_v40 }
 0x15c   : > { %v2648_v9 = vpop.eup %2647  ;;  %v546_v10 = vpack.c.bf16 %v540_v6, %v539_v4  ;;  %v530_v11 = vmul.f32 %v524_v36, %v518_v31 }
 0x15d   : > { %v2650_v12 = vpop.eup %2649  ;;  %v687_v13 = vmul.f32 %v2648_v9, %v2948_v58  ;;  %v543_v26 = vadd.f32 %v536_v52, %v531_v18 }
 0x15e   : > { %v520_v50 = vmul.f32 %v2650_v12, %v2939_v51  ;;  %2377 = vmatmul.mubr.msk.bf16.vlgmr.msra.gmra.mrb[0].mxu0 %vm415_vm0, %v546_v10  ;;  %v542_v17 = vadd.f32 %v536_v52, %v530_v11 }
 0x15f   : > { %v692_v19 = vmul.f32 %v3003_v8, %v687_v13 }
 0x160   : > { %v547_v20 = vpack.c.bf16 %v542_v17, %v541_v41  ;;  %v532_v21 = vmul.f32 %v524_v36, %v520_v50 }
 0x161   : > { %v697_v24 = vadd.f32 %v3007_v14, %v692_v19 }
 0x162   : > { %2380 = vmatprep.mubr.msk.bf16.mxu0 %vm415_vm0, %v547_v20  ;;  %v544_v58 = vadd.f32 %v536_v52, %v532_v21 }
 0x163   : > { %v698_v27 = vpack.c.bf16 %v697_v24, %v697_v24 }
 0x164   : > { %v548_v28 = vpack.c.bf16 %v544_v58, %v543_v26  ;;  %v3057_v58 = vld [vmem:[%s3454_s4] sm:$0xff]  }
 0x165   : > { %2389 = vmatmul.mubr.msk.bf16.vlgmr.msra.gmra.mrb[0].mxu1 %vm673_vm1, %v698_v27 }
 0x166   : > { %2381 = vmatmul.mubr.msk.bf16.gmra.mrb[4].mxu0 %vm415_vm0, %v548_v28  ;;  %2396 = vmatprep.mubr.msk.bf16.mxu1 %vm2776_vm2, %v2775_v1 }
 0x167   : > { %2408 = vmatprep.mubr.msk.bf16.mxu0 %vm2776_vm2, %v2775_v1 }
 0x231   : > { %v2378_v51 = vpop.f32.mrb[0].mxu0 }
 0x232   : > { %v603_v29 = vpop.f32.mrb[1].mxu0 }
 0x233   : > { %634 = vxpose.xlu0.b32.start [1/8] (short) (narrow) %v603_v29, 32  ;;  %v2379_v32 = vpop.f32.mrb[2].mxu0 }
 0x234   : > { %v669_v33 = vpack.c.bf16 %v2379_v32, %v2378_v51  ;;  %v606_v34 = vpop.f32.mrb[3].mxu0 }
 0x235   : > { %v668_v35 = vpack.c.bf16 %v606_v34, %v603_v29 }
 0x237   : > { %635 = vxpose.xlu0.b32.cont [2/8] (short) (narrow) %v606_v34, 32  ;;  %833 = vrot.lane.b32.xlu1 %v668_v35, %s2777_s25  ;;  %v1046_v34 = vsub.s32 3, %v2976_v15 }
 0x238   : > { %v752_v36 = vpop.f32.mrb[0].mxu1 }
 0x239   : > { %v3021_v38 = vpop.f32.mrb[4].mxu0  ;;  %v2390_v39 = vpop.f32.mrb[1].mxu1  ;;  %v758_v60 = vpack.c.bf16 %v752_v36, %v752_v36  ;;  %v1047_v35 = vrot.slane %v2996_v63, %v1046_v34 }
 0x23a   : > { %v619_v42 = vpop.f32.mrb[5].mxu0  ;;  %v755_v43 = vpop.f32.mrb[2].mxu1 }
 0x23b   : > { %636 = vxpose.xlu0.b32.cont [3/8] (short) (narrow) %v2378_v51, 32  ;;  %835 = vrot.lane.b32.xlu1 %v669_v33, %s2777_s25  ;;  %v2383_v44 = vpop.f32.mrb[6].mxu0  ;;  %v2391_v45 = vpop.f32.mrb[3].mxu1  ;;  %v3071_v33 = vld [vmem:[%s3454_s4 + $0x8] sm:$0xff]  }
 0x23c   : > { %v671_v46 = vpack.c.bf16 %v2383_v44, %v3021_v38  ;;  %v622_v47 = vpop.f32.mrb[7].mxu0  ;;  %v3088_v45 = vld [vmem:[%s3455_s5 + $0x8] sm:$0xff]  }
 0x23d   : > { %v670_v48 = vpack.c.bf16 %v622_v47, %v619_v42 }
 0x23f   : > { %637 = vxpose.xlu0.b32.cont [4/8] (short) (narrow) %v2379_v32, 32  ;;  %837 = vrot.lane.b32.xlu1 %v670_v48, %s2777_s25 }
 0x243   : > { %638 = vxpose.xlu0.b32.cont [5/8] (short) (narrow) %v619_v42, 32 }
 0x247   : > { %639 = vxpose.xlu0.b32.cont [6/8] (short) (narrow) %v622_v47, 32 }
 0x24b   : > { %640 = vxpose.xlu0.b32.cont [7/8] (short) (narrow) %v3021_v38, 32  ;;  %v3081_v38 = vld [vmem:[%s3455_s5] sm:$0xff]  }
 0x24f   : > { %641 = vxpose.xlu0.b32.end [8/8] (short) (narrow) %v2383_v44, 32 }
 0x2a9   : > { %v3027_v49 = vpop.permute.xlu1 %833 }
 0x2aa   : > { %2401 = vmatpush3.bf16.msra.mxu0 %v3027_v49 }
 0x2ab   : > { %2402 = vmatprep.subr.bf16.mxu0 %v2775_v1 }
 0x2ad   : > { %v3031_v52 = vpop.permute.xlu1 %835 }
 0x2ae   : > { %2403 = vmatpush3.bf16.msra.mxu0 %v3031_v52 }
 0x2af   : > { %2404 = vmatprep.subr.bf16.mxu0 %v2775_v1 }
 0x2b1   : > { %v3035_v53 = vpop.permute.xlu1 %837 }
 0x2b2   : > { %2405 = vmatpush3.bf16.msra.mxu0 %v3035_v53 }
 0x2b3   : > { %v650_v54 = vpop.trf.xlu0  ;;  %2406 = vmatprep.subr.bf16.mxu0 %v2775_v1 }
 0x2b7   : > { %v651_v55 = vpop.trf.xlu0 }
 0x2b8   : > { %v3039_v56 = vpack.c.bf16 %v651_v55, %v650_v54 }
 0x2ba   : > { %2393 = vmatpush3.bf16.msra.mxu1 %v3039_v56 }
 0x2bb   : > { %v652_v22 = vpop.trf.xlu0  ;;  %2394 = vmatprep.subr.bf16.mxu1 %v2775_v1 }
 0x2bf   : > { %v653_v57 = vpop.trf.xlu0 }
 0x2c0   : > { %v3043_v59 = vpack.c.bf16 %v653_v57, %v652_v22  ;;  %v1037_v57 = vsub.s32 2, %v2976_v15 }
 0x2c2   : > { %2395 = vmatpush3.bf16.msra.mxu1 %v3043_v59 }
 0x2c3   : > { %2412 = vmatprep.subr.bf16.mxu1 %v2775_v1 }
 0x2c5   : > { %2397 = vmatmul.mubr.msk.bf16.vlgmr.msra.gmra.mrb[4].mxu1 %vm673_vm1, %v758_v60 }
 0x2c6   : > { %2416 = vmatprep.mubr.msk.bf16.mxu1 %vm2776_vm2, %v2775_v1  ;;  %2413 = vmatpush3.bf16.msra.mxu1 %v3057_v58 }
 0x2c7   : > { %2414 = vmatprep.subr.bf16.mxu1 %v2775_v1 }
 0x2ca   : > { %2415 = vmatpush3.bf16.msra.mxu1 %v3071_v33 }
 0x2cb   : > { %2420 = vmatprep.subr.bf16.mxu1 %v2775_v1 }
 0x398   : > { %v796_v23 = vpop.f32.mrb[4].mxu1 }
 0x399   : > { %v803_v61 = vsel %vm802_vm3, %v796_v23, -inf  ;;  %v2398_v62 = vpop.f32.mrb[5].mxu1 }
 0x39a   : > { %v804_v30 = vrot.slane %v803_v61, 4  ;;  %v799_v3 = vpop.f32.mrb[6].mxu1 }
 0x39b   : > { %v2399_v4 = vpop.f32.mrb[7].mxu1 }
 0x39c   : > { %v805_v5 = vmax.f32 %v803_v61, %v804_v30  ;;  %v1038_v4 = vrot.slane %v2996_v63, %v1037_v57  ;;  %v3151_v57 = vld [vmem:[%s3456_s6 + $0x8] sm:$0xff]  }
 0x39e   : > { %v806_v40 = vrot.slane %v805_v5, 2 }
 0x3a0   : > { %v807_v31 = vmax.f32 %v805_v5, %v806_v40  ;;  %v3110_v5 = vrot.slane %v2996_v63, %v523_v25 }
 0x3a2   : > { %v808_v6 = vrot.slane %v807_v31, 1 }
 0x3a4   : > { %v809_v7 = vmax.f32 %v807_v31, %v808_v6 }
 0x3a6   : > { %v810_v9 = vsub.f32 %v796_v23, %v809_v7 }
 0x3a8   : > { %v811_v10 = vmul.f32 1.442695, %v810_v9 }
 0x3aa   : > { %2651 = vpow2.f32 %v811_v10 }
 0x3b4   : > { %v2652_v11 = vpop.eup %2651 }
 0x3b5   : > { %v813_v12 = vsel %vm802_vm3, %v2652_v11, 0.0 }
 0x3b6   : > { %v814_v13 = vrot.slane %v813_v12, 4 }
 0x3b8   : > { %v815_v50 = vadd.f32 %v814_v13, %v813_v12  ;;  %v1023_v12 = vrot.slane %v2996_v63, %v535_v37 }
 0x3ba   : > { %v816_v41 = vrot.slane %v815_v50, 2 }
 0x3bc   : > { %v817_v17 = vadd.f32 %v816_v41, %v815_v50 }
 0x3be   : > { %v818_v18 = vrot.slane %v817_v17, 1 }
 0x3c0   : > { %v819_v19 = vadd.f32 %v818_v18, %v817_v17 }
 0x3c2   : > { %2653 = vrcp.f32 %v819_v19 }
 0x3cc   : > { %v2654_v20 = vpop.eup %2653 }
 0x3cd   : > { %v821_v21 = vmul.f32 %v2654_v20, %v2652_v11 }
 0x3cf   : > { %v822_v24 = vadd.f32 1e-08, %v821_v21 }
 0x3d1   : > { %v823_v26 = vsel %vm802_vm3, %v822_v24, 0.0 }
 0x3d2   : > { %824 = vadd.xlane.f32.xlu1 %v823_v26 }
 0x3e3   : > { %839 = vrot.lane.b32.xlu1 %v671_v46, %s2777_s25  ;;  %v948_v46 = vpack.c.bf16 %v2905_v16, %v2905_v16 }
 0x3e7   : > { %1049 = vrot.lane.b32.xlu1 %v1047_v35, %s2778_s14 }
 0x45f   : > { %v825_v27 = vpop.xlane.xlu1 %824 }
 0x460   : > { %2655 = vrcp.f32 %v825_v27 }
 0x463   : > { %v3061_v28 = vpop.permute.xlu1 %839 }
 0x464   : > { %2407 = vmatpush3.bf16.msra.mxu0 %v3061_v28 }
 0x465   : > { %2436 = vmatprep.subr.bf16.mxu0 %v2775_v1 }
 0x467   : > { %v3100_v22 = vpop.permute.xlu1 %1049 }
 0x46a   : > { %v2656_v51 = vpop.eup %2655 }
 0x46b   : > { %v827_v29 = vmul.f32 %v2656_v51, %v822_v24 }
 0x46d   : > { %v828_v32 = vpack.c.bf16 %v827_v29, %v827_v29 }
 0x46f   : > { %2409 = vmatmul.mubr.msk.bf16.vlgmr.msra.gmra.mrb[8].mxu0 %vm802_vm3, %v828_v32 }
 0x470   : > { %2444 = vmatprep.mubr.msk.bf16.mxu0 %vm2776_vm2, %v2775_v1 }
 0x542   : > { %v882_v36 = vpop.f32.mrb[8].mxu0 }
 0x543   : > { %v888_v39 = vpack.c.bf16 %v882_v36, %v882_v36  ;;  %v2410_v42 = vpop.f32.mrb[9].mxu0 }
 0x544   : > { %v885_v43 = vpop.f32.mrb[10].mxu0 }
 0x545   : > { %v2411_v44 = vpop.f32.mrb[11].mxu0  ;;  %2417 = vmatmul.mubr.msk.bf16.vlgmr.msra.gmra.mrb[8].mxu1 %vm673_vm1, %v888_v39 }
 0x546   : > { %2421 = vmatpush3.bf16.msra.mxu1 %v3081_v38  ;;  %2424 = vmatprep.mubr.msk.bf16.mxu1 %vm2776_vm2, %v2775_v1  ;;  %v2261_v44 = vld [vmem:[%s3458_s8 + $0x8] ss:$0 sm:$0xff] }
 0x547   : > { %2422 = vmatprep.subr.bf16.mxu1 %v2775_v1 }
 0x54a   : > { %2423 = vmatpush3.bf16.msra.mxu1 %v3088_v45 }
 0x54b   : > { %2428 = vmatprep.subr.bf16.mxu1 %v2775_v1 }
 0x54d   : > { %2425 = vmatmul.mubr.msk.bf16.vlgmr.msra.gmra.mrb[12].mxu1 %vm673_vm1, %v948_v46 }
 0x54e   : > { %2432 = vmatprep.mubr.msk.bf16.mxu1 %vm2776_vm2, %v2775_v1 }
 0x618   : > { %v942_v47 = vpop.f32.mrb[8].mxu1 }
 0x619   : > { %v2418_v48 = vpop.f32.mrb[9].mxu1 }
 0x61a   : > { %v945_v54 = vpop.f32.mrb[10].mxu1  ;;  %v1099_v48 = vsub.s32 7, %v2976_v15 }
 0x61b   : > { %v2419_v55 = vpop.f32.mrb[11].mxu1 }
 0x61c   : > { %v1100_v54 = vrot.slane %v2996_v63, %v1099_v48  ;;  %v3145_v55 = vld [vmem:[%s3456_s6] sm:$0xff]  }
 0x61d   : > { %2429 = vmatpush3.bf16.msra.mxu1 %v3145_v55 }
 0x61e   : > { %2430 = vmatprep.subr.bf16.mxu1 %v2775_v1 }
 0x620   : > { %v1002_v60 = vpop.f32.mrb[12].mxu1 }
 0x621   : > { %v1008_v23 = vadd.f32 %v1002_v60, %v942_v47  ;;  %v1052_v61 = vadd.f32 %v3100_v22, %v1002_v60  ;;  %v2426_v62 = vpop.f32.mrb[13].mxu1  ;;  %2431 = vmatpush3.bf16.msra.mxu1 %v3151_v57 }
 0x622   : > { %v1005_v30 = vpop.f32.mrb[14].mxu1  ;;  %2448 = vmatprep.subr.bf16.mxu1 %v2775_v1  ;;  %v3159_v62 = vld [vmem:[%s3457_s7] sm:$0xff]  }
 0x623   : > { %v2427_v3 = vpop.f32.mrb[15].mxu1  ;;  %1054 = vrot.lane.b32.xlu1 %v1052_v61, %s2778_s14  ;;  %v1013_v40 = vadd.f32 %v3110_v5, %v1008_v23  ;;  %2437 = vmatpush3.bf16.msra.mxu0 %v3159_v62  ;;  %v3165_v30 = vld [vmem:[%s3457_s7 + $0x8] sm:$0xff]  }
 0x624   : > { %2438 = vmatprep.subr.bf16.mxu0 %v2775_v1 }
 0x625   : > { %v2259_v31 = vmul.f32 -1.442695, %v1013_v40 }
 0x627   : > { %1040 = vrot.lane.b32.xlu1 %v1038_v4, %s2778_s14  ;;  %2657 = vpow2.f32 %v2259_v31  ;;  %2439 = vmatpush3.bf16.msra.mxu0 %v3165_v30 }
 0x628   : > { %2440 = vmatprep.subr.bf16.mxu0 %v2775_v1 }
 0x631   : > { %v2658_v6 = vpop.eup %2657 }
 0x632   : > { %v1017_v7 = vadd.f32 1.0, %v2658_v6  ;;  %v3176_v6 = vld [vmem:[%s3457_s7 + $0x10] sm:$0xff]  }
 0x633   : > { %2441 = vmatpush3.bf16.msra.mxu0 %v3176_v6 }
 0x634   : > { %2659 = vrcp.f32 %v1017_v7  ;;  %2442 = vmatprep.subr.bf16.mxu0 %v2775_v1 }
 0x63e   : > { %v2660_v9 = vpop.eup %2659 }
 0x695   : > { %v1055_v10 = vpop.permute.xlu1 %1054 }
 0x696   : > { %v1057_v11 = vmul.f32 %v2660_v9, %v1055_v10 }
 0x698   : > { %1059 = vrot.lane.b32.xlu1 %v1057_v11, %s2778_s14 }
 0x699   : > { %v3118_v25 = vpop.permute.xlu1 %1040 }
 0x69a   : > { %v1043_v13 = vadd.f32 %v3118_v25, %v942_v47 }
 0x69c   : > { %1025 = vrot.lane.b32.xlu1 %v1023_v12, %s2779_s29  ;;  %v3194_v12 = vld [vmem:[%s3457_s7 + $0x18] sm:$0xff]  }
 0x69d   : > { %2443 = vmatpush3.bf16.msra.mxu0 %v3194_v12 }
 0x69e   : > { %2464 = vmatprep.subr.bf16.mxu0 %v2775_v1 }
 0x70a   : > { %v1060_v50 = vpop.permute.xlu1 %1059 }
 0x70b   : > { %v1062_v41 = vadd.f32 %v1060_v50, %v1043_v13 }
 0x70d   : > { %2661 = vtanh.f32 %v1062_v41 }
 0x70e   : > { %v3124_v18 = vpop.permute.xlu1 %1025 }
 0x70f   : > { %v1028_v37 = vadd.f32 %v3124_v18, %v1008_v23 }
 0x711   : > { %v2260_v19 = vmul.f32 -1.442695, %v1028_v37 }
 0x713   : > { %2663 = vpow2.f32 %v2260_v19 }
 0x717   : > { %v2662_v17 = vpop.eup %2661 }
 0x718   : > { %1066 = vrot.lane.b32.xlu1 %v2662_v17, %s2777_s25 }
 0x71c   : > { %1071 = vrot.lane.b32.xlu1 %v2905_v16, %s2779_s29 }
 0x71d   : > { %v2664_v20 = vpop.eup %2663 }
 0x71e   : > { %v1032_v21 = vadd.f32 1.0, %v2664_v20  ;;  %v1268_v20 = vsub.s32 4, %v2976_v15 }
 0x720   : > { %2665 = vrcp.f32 %v1032_v21  ;;  %v1269_v21 = vrot.slane %v2996_v63, %v1268_v20 }
 0x72a   : > { %v2666_v24 = vpop.eup %2665 }
 0x72b   : > { %v1064_v27 = vsub.f32 1.0, %v2666_v24 }
 0x78a   : > { %v1067_v26 = vpop.permute.xlu1 %1066 }
 0x78b   : > { %v1069_v29 = vmul.f32 %v1067_v26, %v1064_v27 }
 0x78e   : > { %v1072_v51 = vpop.permute.xlu1 %1071 }
 0x78f   : > { %v1074_v32 = vmul.f32 %v2666_v24, %v1072_v51 }
 0x791   : > { %v3127_v34 = vadd.f32 %v1074_v32, %v1069_v29 }
 0x793   : > { %1077 = vrot.lane.b32.xlu1 %v3127_v34, %s2777_s25 }
 0x805   : > { %v1078_v16 = vpop.permute.xlu1 %1077 }
 0x806   : > { %v1080_v35 = vsel %vm673_vm1, %v1078_v16, 0.0 }
 0x807   : > { %1081 = vadd.xlane.f32.xlu1 %v1080_v35 }
 0x894   : > { %v1082_v36 = vpop.xlane.xlu1 %1081 }
 0x895   : > { %v1083_v39 = vmul.f32 0.03125, %v1082_v36 }
 0x897   : > { %v1084_v42 = vsub.f32 %v3127_v34, %v1083_v39 }
 0x899   : > { %v1085_v43 = vmul.f32 %v1084_v42, %v1084_v42 }
 0x89b   : > { %1087 = vrot.lane.b32.xlu0 %v1085_v43, %s2777_s25 }
 0x89f   : > { %1111 = vrot.lane.b32.xlu0 %v2261_v44, %s2779_s29 }
 0x90d   : > { %v1088_v46 = vpop.permute.xlu0 %1087 }
 0x90e   : > { %v1090_v47 = vsel %vm673_vm1, %v1088_v46, 0.0 }
 0x90f   : > { %1091 = vadd.xlane.f32.xlu1 %v1090_v47 }
 0x911   : > { %v3170_v31 = vpop.permute.xlu0 %1111 }
 0x920   : > { %1102 = vrot.lane.b32.xlu1 %v1100_v54, %s2779_s29 }
 0x924   : > { %1271 = vrot.lane.b32.xlu1 %v1269_v21, %s2779_s29 }
 0x99c   : > { %v1092_v60 = vpop.xlane.xlu1 %1091 }
 0x99d   : > { %v1093_v23 = vmul.f32 0.03125, %v1092_v60 }
 0x99f   : > { %v1094_v61 = vadd.f32 0.001, %v1093_v23 }
 0x9a0   : > { %v3168_v4 = vpop.permute.xlu1 %1102 }
 0x9a1   : > { %2667 = vrsqrt.f32 %v1094_v61 }
 0x9a4   : > { %v3219_v32 = vpop.permute.xlu1 %1271 }
 0x9ab   : > { %v2668_v3 = vpop.eup %2667 }
 0x9ac   : > { %v1096_v40 = vmul.f32 %v2668_v3, %v1084_v42 }
 0x9ae   : > { %v1105_v7 = vmul.f32 %v3168_v4, %v1096_v40 }
 0x9b0   : > { %v1114_v9 = vadd.f32 %v3170_v31, %v1105_v7 }
 0x9b2   : > { %v1115_v10 = vpack.c.bf16 %v1114_v9, %v1114_v9 }
 0x9b4   : > { %1127 = vrot.lane.b32.xlu0 %v1115_v10, %s2777_s25 }
 0xa26   : > { %v1128_v11 = vpop.permute.xlu0 %1127 }
 0xa27   : > { %2433 = vmatmul.mubr.msk.bf16.vlgmr.msra.gmra.mrb[16].mxu1 %vm673_vm1, %v1128_v11 }
 0xa28   : > { %2449 = vmatpush3.bf16.msra.mxu1 %v2961_v0  ;;  %2452 = vmatprep.mubr.msk.bf16.mxu1 %vm2776_vm2, %v2775_v1  ;;  %v3201_v0 = vld [vmem:[%s3460_s10] ss:$0 sm:$0xff] }
 0xa29   : > { %2450 = vmatprep.subr.bf16.mxu1 %v2775_v1 }
 0xa2c   : > { %2451 = vmatpush3.bf16.msra.mxu1 %v2970_v2 }
 0xa2d   : > { %2456 = vmatprep.subr.bf16.mxu1 %v2775_v1 }
 0xafa   : > { %v1178_v13 = vpop.f32.mrb[16].mxu1 }
 0xafb   : > { %v1179_v50 = vadd.f32 %v3201_v0, %v1178_v13  ;;  %v2434_v2 = vpop.f32.mrb[17].mxu1 }
 0xafc   : > { %v1181_v41 = vpop.f32.mrb[18].mxu1 }
 0xafd   : > { %v1184_v17 = vmax.f32 %v1179_v50, 0.0  ;;  %v2435_v37 = vpop.f32.mrb[19].mxu1 }
 0xaff   : > { %v1185_v19 = vpack.c.bf16 %v1184_v17, %v1184_v17 }
 0xb01   : > { %2445 = vmatmul.mubr.msk.bf16.vlgmr.msra.gmra.mrb[12].mxu0 %vm802_vm3, %v1185_v19 }
 0xb02   : > { %2465 = vmatpush3.bf16.msra.mxu0 %v3027_v49  ;;  %2472 = vmatprep.mubr.msk.bf16.mxu0 %vm2776_vm2, %v2775_v1 }
 0xb03   : > { %2466 = vmatprep.subr.bf16.mxu0 %v2775_v1 }
 0xb06   : > { %2467 = vmatpush3.bf16.msra.mxu0 %v3031_v52 }
 0xb07   : > { %2468 = vmatprep.subr.bf16.mxu0 %v2775_v1 }
 0xb0a   : > { %2469 = vmatpush3.bf16.msra.mxu0 %v3035_v53 }
 0xb0b   : > { %2470 = vmatprep.subr.bf16.mxu0 %v2775_v1 }
 0xb0e   : > { %2471 = vmatpush3.bf16.msra.mxu0 %v3061_v28 }
 0xb0f   : > { %2492 = vmatprep.subr.bf16.mxu0 %v2775_v1 }
 0xbd4   : > { %v1255_v24 = vpop.f32.mrb[12].mxu0 }
 0xbd5   : > { %1262 = vrot.lane.b32.xlu0 %v1255_v24, %s2779_s29  ;;  %v2446_v26 = vpop.f32.mrb[13].mxu0 }
 0xbd6   : > { %v1258_v27 = vpop.f32.mrb[14].mxu0 }
 0xbd7   : > { %v2447_v51 = vpop.f32.mrb[15].mxu0 }
 0xc47   : > { %v1263_v29 = vpop.permute.xlu0 %1262 }
 0xc48   : > { %v1265_v16 = vadd.f32 %v1263_v29, %v3127_v34 }
 0xc4a   : > { %v3223_v35 = vadd.f32 %v3219_v32, %v1265_v16 }
 0xc4c   : > { %1276 = vrot.lane.b32.xlu0 %v3223_v35, %s2777_s25  ;;  %v1510_v46 = vpack.c.bf16 %v3223_v35, %v3223_v35 }
 0xcbe   : > { %v1277_v15 = vpop.permute.xlu0 %1276 }
 0xcbf   : > { %v1279_v63 = vsel %vm673_vm1, %v1277_v15, 0.0 }
 0xcc0   : > { %1280 = vadd.xlane.f32.xlu1 %v1279_v63 }
 0xcd1   : > { %1297 = vrot.lane.b32.xlu1 %v3003_v8, %s2779_s29 }
 0xd4d   : > { %v1281_v36 = vpop.xlane.xlu1 %1280 }
 0xd4e   : > { %v1282_v39 = vmul.f32 0.03125, %v1281_v36 }
 0xd50   : > { %v1283_v42 = vsub.f32 %v3223_v35, %v1282_v39 }
 0xd51   : > { %v3238_v60 = vpop.permute.xlu1 %1297 }
 0xd52   : > { %v1284_v43 = vmul.f32 %v1283_v42, %v1283_v42 }
 0xd54   : > { %1286 = vrot.lane.b32.xlu0 %v1284_v43, %s2777_s25 }
 0xdc6   : > { %v1287_v34 = vpop.permute.xlu0 %1286 }
 0xdc7   : > { %v1289_v44 = vsel %vm673_vm1, %v1287_v34, 0.0 }
 0xdc8   : > { %1290 = vadd.xlane.f32.xlu0 %v1289_v44 }
 0xdde   : > { %1302 = vrot.lane.b32.xlu0 %v3007_v14, %s2779_s29 }
 0xde2   : > { %1512 = vrot.lane.b32.xlu0 %v1510_v46, %s2777_s25 }
 0xe55   : > { %v1291_v8 = vpop.xlane.xlu0 %1290 }
 0xe56   : > { %v1292_v47 = vmul.f32 0.03125, %v1291_v8 }
 0xe58   : > { %v1293_v48 = vadd.f32 0.001, %v1292_v47 }
 0xe59   : > { %v3241_v3 = vpop.permute.xlu0 %1302 }
 0xe5a   : > { %2669 = vrsqrt.f32 %v1293_v48 }
 0xe64   : > { %v2670_v54 = vpop.eup %2669 }
 0xe65   : > { %v1295_v23 = vmul.f32 %v2670_v54, %v1283_v42 }
 0xe67   : > { %v1300_v61 = vmul.f32 %v3238_v60, %v1295_v23 }
 0xe69   : > { %v1305_v40 = vadd.f32 %v3241_v3, %v1300_v61 }
 0xe6b   : > { %v1306_v14 = vpack.c.bf16 %v1305_v40, %v1305_v40 }
 0xe6d   : > { %1308 = vrot.lane.b32.xlu1 %v1306_v14, %s2777_s25 }
 0xedf   : > { %v1309_v7 = vpop.permute.xlu1 %1308 }
 0xee0   : > { %2453 = vmatmul.mubr.msk.bf16.vlgmr.msra.gmra.mrb[20].mxu1 %vm673_vm1, %v1309_v7 }
 0xee1   : > { %2457 = vmatpush3.bf16.msra.mxu1 %v3039_v56  ;;  %2460 = vmatprep.mubr.msk.bf16.mxu1 %vm2776_vm2, %v2775_v1 }
 0xee2   : > { %2458 = vmatprep.subr.bf16.mxu1 %v2775_v1 }
 0xee5   : > { %2459 = vmatpush3.bf16.msra.mxu1 %v3043_v59 }
 0xee6   : > { %2476 = vmatprep.subr.bf16.mxu1 %v2775_v1 }
 0xfb3   : > { %v1347_v9 = vpop.f32.mrb[20].mxu1 }
 0xfb4   : > { %v1353_v10 = vpack.c.bf16 %v1347_v9, %v1347_v9  ;;  %v2454_v11 = vpop.f32.mrb[21].mxu1 }
 0xfb5   : > { %v1350_v13 = vpop.f32.mrb[22].mxu1 }
 0xfb6   : > { %v2455_v50 = vpop.f32.mrb[23].mxu1  ;;  %2461 = vmatmul.mubr.msk.bf16.vlgmr.msra.gmra.mrb[24].mxu1 %vm673_vm1, %v1353_v10  ;;  %v1513_v13 = vpop.permute.xlu0 %1512 }
 0xfb7   : > { %2477 = vmatpush3.bf16.msra.mxu1 %v3057_v58  ;;  %2480 = vmatprep.mubr.msk.bf16.mxu1 %vm2776_vm2, %v2775_v1 }
 0xfb8   : > { %2478 = vmatprep.subr.bf16.mxu1 %v2775_v1 }
 0xfbb   : > { %2479 = vmatpush3.bf16.msra.mxu1 %v3071_v33 }
 0xfbc   : > { %2484 = vmatprep.subr.bf16.mxu1 %v2775_v1 }
0x1089   : > { %v1391_v2 = vpop.f32.mrb[24].mxu1 }
0x108a   : > { %v1397_v41 = vsel %vm802_vm3, %v1391_v2, -inf  ;;  %v2462_v17 = vpop.f32.mrb[25].mxu1 }
0x108b   : > { %v1398_v37 = vrot.slane %v1397_v41, 4  ;;  %v1394_v19 = vpop.f32.mrb[26].mxu1 }
0x108c   : > { %v2463_v20 = vpop.f32.mrb[27].mxu1 }
0x108d   : > { %v1399_v21 = vmax.f32 %v1397_v41, %v1398_v37 }
0x108f   : > { %v1400_v24 = vrot.slane %v1399_v21, 2 }
0x1091   : > { %v1401_v26 = vmax.f32 %v1399_v21, %v1400_v24 }
0x1093   : > { %v1402_v27 = vrot.slane %v1401_v26, 1 }
0x1095   : > { %v1403_v51 = vmax.f32 %v1401_v26, %v1402_v27 }
0x1097   : > { %v1404_v29 = vsub.f32 %v1391_v2, %v1403_v51 }
0x1099   : > { %v1405_v16 = vmul.f32 1.442695, %v1404_v29 }
0x109b   : > { %2671 = vpow2.f32 %v1405_v16 }
0x10a5   : > { %v2672_v15 = vpop.eup %2671 }
0x10a6   : > { %v1407_v63 = vsel %vm802_vm3, %v2672_v15, 0.0 }
0x10a7   : > { %v1408_v36 = vrot.slane %v1407_v63, 4 }
0x10a9   : > { %v1409_v39 = vadd.f32 %v1408_v36, %v1407_v63 }
0x10ab   : > { %v1410_v42 = vrot.slane %v1409_v39, 2 }
0x10ad   : > { %v1411_v43 = vadd.f32 %v1410_v42, %v1409_v39 }
0x10af   : > { %v1412_v34 = vrot.slane %v1411_v43, 1 }
0x10b1   : > { %v1413_v44 = vadd.f32 %v1412_v34, %v1411_v43 }
0x10b3   : > { %2673 = vrcp.f32 %v1413_v44 }
0x10bd   : > { %v2674_v46 = vpop.eup %2673 }
0x10be   : > { %v1415_v8 = vmul.f32 %v2674_v46, %v2672_v15 }
0x10c0   : > { %v1416_v47 = vadd.f32 1e-08, %v1415_v8 }
0x10c2   : > { %v1417_v48 = vsel %vm802_vm3, %v1416_v47, 0.0 }
0x10c3   : > { %1418 = vadd.xlane.f32.xlu1 %v1417_v48 }
0x1150   : > { %v1419_v54 = vpop.xlane.xlu1 %1418 }
0x1151   : > { %2675 = vrcp.f32 %v1419_v54 }
0x115b   : > { %v2676_v23 = vpop.eup %2675 }
0x115c   : > { %v1421_v61 = vmul.f32 %v2676_v23, %v1416_v47 }
0x115e   : > { %v1422_v40 = vpack.c.bf16 %v1421_v61, %v1421_v61 }
0x1160   : > { %2473 = vmatmul.mubr.msk.bf16.vlgmr.msra.gmra.mrb[16].mxu0 %vm802_vm3, %v1422_v40 }
0x1161   : > { %2493 = vmatpush3.bf16.msra.mxu0 %v3145_v55  ;;  %2496 = vmatprep.mubr.msk.bf16.mxu0 %vm2776_vm2, %v2775_v1 }
0x1162   : > { %2494 = vmatprep.subr.bf16.mxu0 %v2775_v1 }
0x1165   : > { %2495 = vmatpush3.bf16.msra.mxu0 %v3151_v57 }
0x1166   : > { %2512 = vmatprep.subr.bf16.mxu0 %v2775_v1 }
0x1233   : > { %v1460_v14 = vpop.f32.mrb[16].mxu0 }
0x1234   : > { %v1466_v7 = vpack.c.bf16 %v1460_v14, %v1460_v14  ;;  %v2474_v9 = vpop.f32.mrb[17].mxu0 }
0x1235   : > { %v1463_v10 = vpop.f32.mrb[18].mxu0 }
0x1236   : > { %v2475_v11 = vpop.f32.mrb[19].mxu0  ;;  %2481 = vmatmul.mubr.msk.bf16.vlgmr.msra.gmra.mrb[28].mxu1 %vm673_vm1, %v1466_v7 }
0x1237   : > { %2485 = vmatpush3.bf16.msra.mxu1 %v3081_v38  ;;  %2488 = vmatprep.mubr.msk.bf16.mxu1 %vm2776_vm2, %v2775_v1 }
0x1238   : > { %2486 = vmatprep.subr.bf16.mxu1 %v2775_v1 }
0x123b   : > { %2487 = vmatpush3.bf16.msra.mxu1 %v3088_v45 }
0x123c   : > { %2500 = vmatprep.subr.bf16.mxu1 %v2775_v1 }
0x123e   : > { %2489 = vmatmul.mubr.msk.bf16.vlgmr.msra.gmra.mrb[32].mxu1 %vm673_vm1, %v1513_v13 }
0x123f   : > { %2501 = vmatpush3.bf16.msra.mxu1 %v3159_v62  ;;  %2508 = vmatprep.mubr.msk.bf16.mxu1 %vm2776_vm2, %v2775_v1 }
0x1240   : > { %2502 = vmatprep.subr.bf16.mxu1 %v2775_v1 }
0x1243   : > { %2503 = vmatpush3.bf16.msra.mxu1 %v3165_v30 }
0x1244   : > { %2504 = vmatprep.subr.bf16.mxu1 %v2775_v1 }
0x1247   : > { %2505 = vmatpush3.bf16.msra.mxu1 %v3176_v6 }
0x1248   : > { %2506 = vmatprep.subr.bf16.mxu1 %v2775_v1 }
0x124b   : > { %2507 = vmatpush3.bf16.msra.mxu1 %v3194_v12 }
0x124c   : > { %2528 = vmatprep.subr.bf16.mxu1 %v2775_v1 }
0x1309   : > { %v1504_v50 = vpop.f32.mrb[28].mxu1 }
0x130a   : > { %v2482_v2 = vpop.f32.mrb[29].mxu1  ;;  %v1572_v39 = vadd.f32 %v1504_v50, %v3118_v25 }
0x130b   : > { %v1507_v41 = vpop.f32.mrb[30].mxu1 }
0x130c   : > { %v2483_v17 = vpop.f32.mrb[31].mxu1 }
0x1311   : > { %v1551_v37 = vpop.f32.mrb[32].mxu1 }
0x1312   : > { %v1557_v19 = vadd.f32 %v1551_v37, %v1504_v50  ;;  %v1573_v20 = vadd.f32 %v1551_v37, %v3100_v22  ;;  %v2490_v21 = vpop.f32.mrb[33].mxu1 }
0x1313   : > { %v1554_v24 = vpop.f32.mrb[34].mxu1 }
0x1314   : > { %1575 = vrot.lane.b32.xlu0 %v1573_v20, %s2778_s14  ;;  %v2491_v26 = vpop.f32.mrb[35].mxu1  ;;  %v1558_v27 = vadd.f32 %v1557_v19, %v3110_v5  ;;  %v1565_v44 = vadd.f32 %v1557_v19, %v3124_v18 }
0x1316   : > { %v2276_v51 = vmul.f32 -1.442695, %v1558_v27  ;;  %v2277_v46 = vmul.f32 -1.442695, %v1565_v44 }
0x1318   : > { %2677 = vpow2.f32 %v2276_v51  ;;  %v2709_v51 = vld [vmem:[%s3453_s3] sm:$0xff]  }
0x1322   : > { %v2678_v29 = vpop.eup %2677 }
0x1323   : > { %v1562_v16 = vadd.f32 1.0, %v2678_v29  ;;  %v2710_v29 = vld [vmem:[%s3453_s3 + $0x8] sm:$0xff]  }
0x1325   : > { %2679 = vrcp.f32 %v1562_v16 }
0x132f   : > { %v2680_v15 = vpop.eup %2679 }
0x1386   : > { %v1576_v63 = vpop.permute.xlu0 %1575 }
0x1387   : > { %v1578_v36 = vmul.f32 %v2680_v15, %v1576_v63 }
0x1389   : > { %1580 = vrot.lane.b32.xlu0 %v1578_v36, %s2778_s14 }
0x13fb   : > { %v1581_v42 = vpop.permute.xlu0 %1580 }
0x13fc   : > { %v1583_v43 = vadd.f32 %v1581_v42, %v1572_v39 }
0x13fe   : > { %2681 = vtanh.f32 %v1583_v43 }
0x13ff   : > { %2683 = vpow2.f32 %v2277_v46 }
0x1408   : > { %v2682_v34 = vpop.eup %2681 }
0x1409   : > { %1587 = vrot.lane.b32.xlu0 %v2682_v34, %s2777_s25  ;;  %v2684_v8 = vpop.eup %2683 }
0x140a   : > { %v1569_v47 = vadd.f32 1.0, %v2684_v8 }
0x140c   : > { %2685 = vrcp.f32 %v1569_v47 }
0x1416   : > { %v2686_v48 = vpop.eup %2685 }
0x1417   : > { %v1585_v54 = vsub.f32 1.0, %v2686_v48  ;;  %v1591_v61 = vmul.f32 %v2686_v48, %v3223_v35 }
0x147b   : > { %v1588_v23 = vpop.permute.xlu0 %1587 }
0x147c   : > { %v1590_v40 = vmul.f32 %v1588_v23, %v1585_v54 }
0x147e   : > { %v1592_v14 = vadd.f32 %v1591_v61, %v1590_v40 }
0x1480   : > { %1594 = vrot.lane.b32.xlu0 %v1592_v14, %s2777_s25 }
0x14f2   : > { %v1595_v7 = vpop.permute.xlu0 %1594 }
0x14f3   : > { %v1597_v9 = vsel %vm673_vm1, %v1595_v7, 0.0 }
0x14f4   : > { %1598 = vadd.xlane.f32.xlu0 %v1597_v9 }
0x1581   : > { %v1599_v10 = vpop.xlane.xlu0 %1598 }
0x1582   : > { %v1600_v11 = vmul.f32 0.03125, %v1599_v10 }
0x1584   : > { %v1601_v13 = vsub.f32 %v1592_v14, %v1600_v11 }
0x1586   : > { %v1602_v50 = vmul.f32 %v1601_v13, %v1601_v13 }
0x1588   : > { %1604 = vrot.lane.b32.xlu1 %v1602_v50, %s2777_s25 }
0x15fa   : > { %v1605_v2 = vpop.permute.xlu1 %1604 }
0x15fb   : > { %v1607_v41 = vsel %vm673_vm1, %v1605_v2, 0.0 }
0x15fc   : > { %1608 = vadd.xlane.f32.xlu1 %v1607_v41 }
0x1689   : > { %v1609_v17 = vpop.xlane.xlu1 %1608 }
0x168a   : > { %v1610_v35 = vmul.f32 0.03125, %v1609_v17 }
0x168c   : > { %v1611_v37 = vadd.f32 0.001, %v1610_v35 }
0x168e   : > { %2687 = vrsqrt.f32 %v1611_v37 }
0x1698   : > { %v2688_v19 = vpop.eup %2687 }
0x1699   : > { %v1613_v20 = vmul.f32 %v2688_v19, %v1601_v13 }
0x169b   : > { %v1614_v21 = vmul.f32 %v1613_v20, %v3168_v4 }
0x169d   : > { %v1615_v24 = vadd.f32 %v1614_v21, %v3170_v31 }
0x169f   : > { %v1616_v26 = vpack.c.bf16 %v1615_v24, %v1615_v24 }
0x16a1   : > { %1618 = vrot.lane.b32.xlu0 %v1616_v26, %s2777_s25 }
0x1713   : > { %v1619_v27 = vpop.permute.xlu0 %1618 }
0x1714   : > { %2497 = vmatmul.mubr.msk.bf16.vlgmr.msra.gmra.mrb[20].mxu0 %vm673_vm1, %v1619_v27 }
0x1715   : > { %2513 = vmatpush3.bf16.msra.mxu0 %v2709_v51  ;;  %2516 = vmatprep.mubr.msk.bf16.mxu0 %vm2776_vm2, %v2775_v1 }
0x1716   : > { %2514 = vmatprep.subr.bf16.mxu0 %v2775_v1 }
0x1719   : > { %2515 = vmatpush3.bf16.msra.mxu0 %v2710_v29 }
0x171a   : > { %2520 = vmatprep.subr.bf16.mxu0 %v2775_v1 }
0x17e7   : > { %v1657_v16 = vpop.f32.mrb[20].mxu0 }
0x17e8   : > { %v1658_v15 = vadd.f32 %v3201_v0, %v1657_v16  ;;  %v2498_v63 = vpop.f32.mrb[21].mxu0 }
0x17e9   : > { %v1660_v36 = vpop.f32.mrb[22].mxu0 }
0x17ea   : > { %v1663_v39 = vmax.f32 %v1658_v15, 0.0  ;;  %v2499_v42 = vpop.f32.mrb[23].mxu0 }
0x17ec   : > { %v1664_v43 = vpack.c.bf16 %v1663_v39, %v1663_v39 }
0x17ee   : > { %2509 = vmatmul.mubr.msk.bf16.vlgmr.msra.gmra.mrb[36].mxu1 %vm802_vm3, %v1664_v43 }
0x17ef   : > { %2529 = vmatpush3.bf16.msra.mxu1 %v3027_v49  ;;  %2536 = vmatprep.mubr.msk.bf16.mxu1 %vm2776_vm2, %v2775_v1 }
0x17f0   : > { %2530 = vmatprep.subr.bf16.mxu1 %v2775_v1 }
0x17f3   : > { %2531 = vmatpush3.bf16.msra.mxu1 %v3031_v52 }
0x17f4   : > { %2532 = vmatprep.subr.bf16.mxu1 %v2775_v1 }
0x17f7   : > { %2533 = vmatpush3.bf16.msra.mxu1 %v3035_v53 }
0x17f8   : > { %2534 = vmatprep.subr.bf16.mxu1 %v2775_v1 }
0x17fb   : > { %2535 = vmatpush3.bf16.msra.mxu1 %v3061_v28 }
0x17fc   : > { %2556 = vmatprep.subr.bf16.mxu1 %v2775_v1 }
0x18c1   : > { %v1702_v34 = vpop.f32.mrb[36].mxu1 }
0x18c2   : > { %1709 = vrot.lane.b32.xlu0 %v1702_v34, %s2779_s29  ;;  %v2510_v49 = vpop.f32.mrb[37].mxu1 }
0x18c3   : > { %v1705_v44 = vpop.f32.mrb[38].mxu1 }
0x18c4   : > { %v2511_v46 = vpop.f32.mrb[39].mxu1 }
0x1934   : > { %v1710_v8 = vpop.permute.xlu0 %1709 }
0x1935   : > { %v1712_v47 = vadd.f32 %v1710_v8, %v1592_v14 }
0x1937   : > { %v3327_v52 = vadd.f32 %v1712_v47, %v3219_v32 }
0x1939   : > { %1715 = vrot.lane.b32.xlu0 %v3327_v52, %s2777_s25  ;;  %v1941_v7 = vpack.c.bf16 %v3327_v52, %v3327_v52 }
0x19ab   : > { %v1716_v53 = vpop.permute.xlu0 %1715 }
0x19ac   : > { %v1718_v48 = vsel %vm673_vm1, %v1716_v53, 0.0 }
0x19ad   : > { %1719 = vadd.xlane.f32.xlu0 %v1718_v48 }
0x1a3a   : > { %v1720_v28 = vpop.xlane.xlu0 %1719 }
0x1a3b   : > { %v1721_v54 = vmul.f32 0.03125, %v1720_v28 }
0x1a3d   : > { %v1722_v23 = vsub.f32 %v3327_v52, %v1721_v54 }
0x1a3f   : > { %v1723_v61 = vmul.f32 %v1722_v23, %v1722_v23 }
0x1a41   : > { %1725 = vrot.lane.b32.xlu1 %v1723_v61, %s2777_s25 }
0x1ab3   : > { %v1726_v40 = vpop.permute.xlu1 %1725 }
0x1ab4   : > { %v1728_v14 = vsel %vm673_vm1, %v1726_v40, 0.0 }
0x1ab5   : > { %1729 = vadd.xlane.f32.xlu1 %v1728_v14 }
0x1ac6   : > { %1943 = vrot.lane.b32.xlu1 %v1941_v7, %s2777_s25 }
0x1b42   : > { %v1730_v9 = vpop.xlane.xlu1 %1729 }
0x1b43   : > { %v1731_v10 = vmul.f32 0.03125, %v1730_v9 }
0x1b45   : > { %v1732_v11 = vadd.f32 0.001, %v1731_v10 }
0x1b47   : > { %2689 = vrsqrt.f32 %v1732_v11 }
0x1b51   : > { %v2690_v13 = vpop.eup %2689 }
0x1b52   : > { %v1734_v50 = vmul.f32 %v2690_v13, %v1722_v23 }
0x1b54   : > { %v1735_v2 = vmul.f32 %v1734_v50, %v3238_v60 }
0x1b56   : > { %v1736_v41 = vadd.f32 %v1735_v2, %v3241_v3 }
0x1b58   : > { %v1737_v17 = vpack.c.bf16 %v1736_v41, %v1736_v41 }
0x1b5a   : > { %1739 = vrot.lane.b32.xlu0 %v1737_v17, %s2777_s25 }
0x1bcc   : > { %v1740_v35 = vpop.permute.xlu0 %1739 }
0x1bcd   : > { %2517 = vmatmul.mubr.msk.bf16.vlgmr.msra.gmra.mrb[24].mxu0 %vm673_vm1, %v1740_v35 }
0x1bce   : > { %2521 = vmatpush3.bf16.msra.mxu0 %v3039_v56  ;;  %2524 = vmatprep.mubr.msk.bf16.mxu0 %vm2776_vm2, %v2775_v1 }
0x1bcf   : > { %2522 = vmatprep.subr.bf16.mxu0 %v2775_v1 }
0x1bd2   : > { %2523 = vmatpush3.bf16.msra.mxu0 %v3043_v59 }
0x1bd3   : > { %2540 = vmatprep.subr.bf16.mxu0 %v2775_v1 }
0x1ca0   : > { %v1778_v60 = vpop.f32.mrb[24].mxu0 }
0x1ca1   : > { %v1784_v37 = vpack.c.bf16 %v1778_v60, %v1778_v60  ;;  %v2518_v3 = vpop.f32.mrb[25].mxu0 }
0x1ca2   : > { %v1781_v19 = vpop.f32.mrb[26].mxu0 }
0x1ca3   : > { %v2519_v20 = vpop.f32.mrb[27].mxu0  ;;  %2525 = vmatmul.mubr.msk.bf16.vlgmr.msra.gmra.mrb[28].mxu0 %vm673_vm1, %v1784_v37 }
0x1ca4   : > { %2541 = vmatpush3.bf16.msra.mxu0 %v3057_v58  ;;  %2544 = vmatprep.mubr.msk.bf16.mxu0 %vm2776_vm2, %v2775_v1 }
0x1ca5   : > { %2542 = vmatprep.subr.bf16.mxu0 %v2775_v1 }
0x1ca8   : > { %2543 = vmatpush3.bf16.msra.mxu0 %v3071_v33 }
0x1ca9   : > { %2548 = vmatprep.subr.bf16.mxu0 %v2775_v1 }
0x1d76   : > { %v1822_v56 = vpop.f32.mrb[28].mxu0 }
0x1d77   : > { %v1828_v59 = vsel %vm802_vm3, %v1822_v56, -inf  ;;  %v2526_v21 = vpop.f32.mrb[29].mxu0 }
0x1d78   : > { %v1829_v24 = vrot.slane %v1828_v59, 4  ;;  %v1825_v26 = vpop.f32.mrb[30].mxu0 }
0x1d79   : > { %v2527_v27 = vpop.f32.mrb[31].mxu0 }
0x1d7a   : > { %v1830_v51 = vmax.f32 %v1828_v59, %v1829_v24 }
0x1d7c   : > { %v1831_v29 = vrot.slane %v1830_v51, 2 }
0x1d7e   : > { %v1832_v16 = vmax.f32 %v1830_v51, %v1831_v29 }
0x1d80   : > { %v1833_v58 = vrot.slane %v1832_v16, 1 }
0x1d82   : > { %v1834_v15 = vmax.f32 %v1832_v16, %v1833_v58 }
0x1d84   : > { %v1835_v63 = vsub.f32 %v1822_v56, %v1834_v15 }
0x1d86   : > { %v1836_v36 = vmul.f32 1.442695, %v1835_v63 }
0x1d88   : > { %2691 = vpow2.f32 %v1836_v36 }
0x1d92   : > { %v2692_v39 = vpop.eup %2691 }
0x1d93   : > { %v1838_v33 = vsel %vm802_vm3, %v2692_v39, 0.0 }
0x1d94   : > { %v1839_v42 = vrot.slane %v1838_v33, 4 }
0x1d96   : > { %v1840_v43 = vadd.f32 %v1839_v42, %v1838_v33 }
0x1d98   : > { %v1841_v34 = vrot.slane %v1840_v43, 2 }
0x1d9a   : > { %v1842_v49 = vadd.f32 %v1841_v34, %v1840_v43 }
0x1d9c   : > { %v1843_v44 = vrot.slane %v1842_v49, 1 }
0x1d9e   : > { %v1844_v46 = vadd.f32 %v1843_v44, %v1842_v49 }
0x1da0   : > { %2693 = vrcp.f32 %v1844_v46 }
0x1daa   : > { %v2694_v8 = vpop.eup %2693 }
0x1dab   : > { %v1846_v47 = vmul.f32 %v2694_v8, %v2692_v39 }
0x1dad   : > { %v1847_v53 = vadd.f32 1e-08, %v1846_v47 }
0x1daf   : > { %v1848_v48 = vsel %vm802_vm3, %v1847_v53, 0.0 }
0x1db0   : > { %1849 = vadd.xlane.f32.xlu0 %v1848_v48 }
0x1e3d   : > { %v1850_v28 = vpop.xlane.xlu0 %1849 }
0x1e3e   : > { %2695 = vrcp.f32 %v1850_v28 }
0x1e48   : > { %v2696_v54 = vpop.eup %2695 }
0x1e49   : > { %v1852_v23 = vmul.f32 %v2696_v54, %v1847_v53 }
0x1e4b   : > { %v1853_v61 = vpack.c.bf16 %v1852_v23, %v1852_v23 }
0x1e4d   : > { %2537 = vmatmul.mubr.msk.bf16.vlgmr.msra.gmra.mrb[40].mxu1 %vm802_vm3, %v1853_v61 }
0x1e4e   : > { %2557 = vmatpush3.bf16.msra.mxu1 %v3145_v55  ;;  %2560 = vmatprep.mubr.msk.bf16.mxu1 %vm2776_vm2, %v2775_v1  ;;  %v1944_v55 = vpop.permute.xlu1 %1943 }
0x1e4f   : > { %2558 = vmatprep.subr.bf16.mxu1 %v2775_v1 }
0x1e52   : > { %2559 = vmatpush3.bf16.msra.mxu1 %v3151_v57 }
0x1f20   : > { %v1891_v40 = vpop.f32.mrb[40].mxu1 }
0x1f21   : > { %v1897_v14 = vpack.c.bf16 %v1891_v40, %v1891_v40  ;;  %v2538_v7 = vpop.f32.mrb[41].mxu1 }
0x1f22   : > { %v1894_v9 = vpop.f32.mrb[42].mxu1 }
0x1f23   : > { %v2539_v10 = vpop.f32.mrb[43].mxu1  ;;  %2545 = vmatmul.mubr.msk.bf16.vlgmr.msra.gmra.mrb[32].mxu0 %vm673_vm1, %v1897_v14 }
0x1f24   : > { %2549 = vmatpush3.bf16.msra.mxu0 %v3081_v38  ;;  %2552 = vmatprep.mubr.msk.bf16.mxu0 %vm2776_vm2, %v2775_v1 }
0x1f25   : > { %2550 = vmatprep.subr.bf16.mxu0 %v2775_v1 }
0x1f28   : > { %2551 = vmatpush3.bf16.msra.mxu0 %v3088_v45 }
0x1f29   : > { %2564 = vmatprep.subr.bf16.mxu0 %v2775_v1 }
0x1f2b   : > { %2553 = vmatmul.mubr.msk.bf16.vlgmr.msra.gmra.mrb[36].mxu0 %vm673_vm1, %v1944_v55 }
0x1f2c   : > { %2565 = vmatpush3.bf16.msra.mxu0 %v3159_v62  ;;  %2572 = vmatprep.mubr.msk.bf16.mxu0 %vm2776_vm2, %v2775_v1 }
0x1f2d   : > { %2566 = vmatprep.subr.bf16.mxu0 %v2775_v1 }
0x1f30   : > { %2567 = vmatpush3.bf16.msra.mxu0 %v3165_v30 }
0x1f31   : > { %2568 = vmatprep.subr.bf16.mxu0 %v2775_v1 }
0x1f34   : > { %2569 = vmatpush3.bf16.msra.mxu0 %v3176_v6 }
0x1f35   : > { %2570 = vmatprep.subr.bf16.mxu0 %v2775_v1 }
0x1f38   : > { %2571 = vmatpush3.bf16.msra.mxu0 %v3194_v12 }
0x1ff6   : > { %v1935_v38 = vpop.f32.mrb[32].mxu0 }
0x1ff7   : > { %v2546_v45 = vpop.f32.mrb[33].mxu0  ;;  %v2003_v3 = vadd.f32 %v1935_v38, %v3118_v25 }
0x1ff8   : > { %v1938_v57 = vpop.f32.mrb[34].mxu0 }
0x1ff9   : > { %v2547_v11 = vpop.f32.mrb[35].mxu0 }
0x1ffe   : > { %v1982_v62 = vpop.f32.mrb[36].mxu0 }
0x1fff   : > { %v1988_v13 = vadd.f32 %v1982_v62, %v1935_v38  ;;  %v2004_v50 = vadd.f32 %v1982_v62, %v3100_v22  ;;  %v2554_v2 = vpop.f32.mrb[37].mxu0 }
0x2000   : > { %v1985_v41 = vpop.f32.mrb[38].mxu0 }
0x2001   : > { %2006 = vrot.lane.b32.xlu1 %v2004_v50, %s2778_s14  ;;  %v2555_v30 = vpop.f32.mrb[39].mxu0  ;;  %v1989_v17 = vadd.f32 %v1988_v13, %v3110_v5  ;;  %v1996_v5 = vadd.f32 %v1988_v13, %v3124_v18 }
0x2003   : > { %v2285_v6 = vmul.f32 -1.442695, %v1989_v17  ;;  %v2286_v56 = vmul.f32 -1.442695, %v1996_v5 }
0x2005   : > { %2697 = vpow2.f32 %v2285_v6 }
0x200f   : > { %v2698_v1 = vpop.eup %2697 }
0x2010   : > { %v1993_v35 = vadd.f32 1.0, %v2698_v1 }
0x2012   : > { %2699 = vrcp.f32 %v1993_v35 }
0x201c   : > { %v2700_v12 = vpop.eup %2699 }
0x2073   : > { %v2007_v60 = vpop.permute.xlu1 %2006 }
0x2074   : > { %v2009_v37 = vmul.f32 %v2700_v12, %v2007_v60 }
0x2076   : > { %2011 = vrot.lane.b32.xlu1 %v2009_v37, %s2778_s14  ;;  %s390_s14 = sand.u32 1, %s2765_s18  }
0x2077   : > { %s2239_s24 = sshll.u32 %s390_s14, 3 }
0x2078   : > { %s392_s12 = scalar_lea.vmem [#allocation2], %s2239_s24  ;;  %s2715_s24 = sshll.u32 %s2780_s21, 4  ;;  %s2716_s24 = int_to_ptr.vmem [resolvable:$false] %s2715_s24 }
0x2079   : > { %s2164_s13 = sshll.u32 %s392_s12, 4  ;;  %s2717_s15 = scalar_lea.vmem %s2716_s24, 256  ;;  %s3409_s13 = int_to_ptr.vmem [resolvable:$true] %s2164_s13 }
0x207a   : > { %p2718_p0 = scmp.lt.s32.totalorder %s3409_s13, %s2716_s24 }
0x20e8   : > { %v2012_v22 = vpop.permute.xlu1 %2011 }
0x20e9   : > { %v2014_v19 = vadd.f32 %v2012_v22, %v2003_v3 }
0x20eb   : > { %2701 = vtanh.f32 %v2014_v19 }
0x20ec   : > { %2703 = vpow2.f32 %v2286_v56 }
0x20f5   : > { %v2702_v20 = vpop.eup %2701 }
0x20f6   : > { %2018 = vrot.lane.b32.xlu1 %v2702_v20, %s2777_s25  ;;  %v2704_v59 = vpop.eup %2703 }
0x20f7   : > { %v2000_v21 = vadd.f32 1.0, %v2704_v59 }
0x20f9   : > { %2705 = vrcp.f32 %v2000_v21 }
0x2103   : > { %v2706_v24 = vpop.eup %2705 }
0x2104   : > { %v2016_v26 = vsub.f32 1.0, %v2706_v24  ;;  %v2022_v51 = vmul.f32 %v2706_v24, %v3327_v52 }
0x2168   : > { %v2019_v27 = vpop.permute.xlu1 %2018 }
0x2169   : > { %v2021_v29 = vmul.f32 %v2019_v27, %v2016_v26 }
0x216b   : > { %v2023_v25 = vadd.f32 %v2022_v51, %v2021_v29 }
0x216d   : > { %2025 = vrot.lane.b32.xlu0 %v2023_v25, %s2777_s25 }
0x21df   : > { %v2026_v16 = vpop.permute.xlu0 %2025 }
0x21e0   : > { %v2028_v58 = vsel %vm673_vm1, %v2026_v16, 0.0 }
0x21e1   : > { %2029 = vadd.xlane.f32.xlu1 %v2028_v58 }
0x226e   : > { %v2030_v15 = vpop.xlane.xlu1 %2029 }
0x226f   : > { %v2031_v18 = vmul.f32 0.03125, %v2030_v15 }
0x2271   : > { %v2032_v63 = vsub.f32 %v2023_v25, %v2031_v18 }
0x2273   : > { %v2033_v36 = vmul.f32 %v2032_v63, %v2032_v63 }
0x2275   : > { %2035 = vrot.lane.b32.xlu0 %v2033_v36, %s2777_s25 }
0x22e7   : > { %v2036_v39 = vpop.permute.xlu0 %2035 }
0x22e8   : > { %v2038_v33 = vsel %vm673_vm1, %v2036_v39, 0.0 }
0x22e9   : > { %2039 = vadd.xlane.f32.xlu0 %v2038_v33 }
0x2376   : > { %v2040_v42 = vpop.xlane.xlu0 %2039 }
0x2377   : > { %v2041_v52 = vmul.f32 0.03125, %v2040_v42 }
0x2379   : > { %v2042_v43 = vadd.f32 0.001, %v2041_v52 }
0x237b   : > { %2707 = vrsqrt.f32 %v2042_v43 }
0x2385   : > { %v2708_v34 = vpop.eup %2707 }
0x2386   : > { %v2044_v49 = vmul.f32 %v2708_v34, %v2032_v63 }
0x2388   : > { %v2045_v44 = vmul.f32 %v2044_v49, %v3168_v4 }
0x238a   : > { %v2046_v46 = vadd.f32 %v2045_v44, %v3170_v31 }
0x238c   : > { %v2047_v8 = vpack.c.bf16 %v2046_v46, %v2046_v46 }
0x238e   : > { %2049 = vrot.lane.b32.xlu1 %v2047_v8, %s2777_s25 }
0x2400   : > { %v2050_v47 = vpop.permute.xlu1 %2049 }
0x2401   : > { %2561 = vmatmul.mubr.msk.bf16.vlgmr.msra.gmra.mrb[44].mxu1 %vm673_vm1, %v2050_v47 }
0x24d4   : > { %v2088_v53 = vpop.f32.mrb[44].mxu1 }
0x24d5   : > { %v2089_v48 = vadd.f32 %v3201_v0, %v2088_v53  ;;  %v2562_v28 = vpop.f32.mrb[45].mxu1 }
0x24d6   : > { %v2091_v54 = vpop.f32.mrb[46].mxu1 }
0x24d7   : > { %v2094_v23 = vmax.f32 %v2089_v48, 0.0  ;;  %v2563_v61 = vpop.f32.mrb[47].mxu1 }
0x24d9   : > { %v2095_v40 = vpack.c.bf16 %v2094_v23, %v2094_v23 }
0x24db   : > { %2573 = vmatmul.mubr.msk.bf16.vlgmr.msra.gmra.mrb[40].mxu0 %vm802_vm3, %v2095_v40 }
0x25ae   : > { %v2133_v4 = vpop.f32.mrb[40].mxu0 }
0x25af   : > { %2140 = vrot.lane.b32.xlu1 %v2133_v4, %s2779_s29  ;;  %v2574_v31 = vpop.f32.mrb[41].mxu0  ;;  %s2151_s29 = scalar_lea.sflag [#allocation3], %s390_s14 }
0x25b0   : > { %v2136_v14 = vpop.f32.mrb[42].mxu0 }
0x25b1   : > { %v2575_v7 = vpop.f32.mrb[43].mxu0 }
0x2621   : > { %v2141_v9 = vpop.permute.xlu1 %2140 }
0x2622   : > { %v2143_v10 = vadd.f32 %v2141_v9, %v2023_v25 }
0x2624   : > { %v2144_v0 = vadd.f32 %v2143_v10, %v3219_v32 }
0x2626   : > { %2146 = vrot.lane.b32.xlu0 %v2144_v0, %s2777_s25  ;;  %s2711_s25 = scalar_lea.vmem %s3409_s13, 128 }
0x2627   : > { %p2712_p11 = scmp.ne.s32.totalorder %s3409_s13, %s2711_s25  ;;  %p2719_p1 = scmp.lt.s32.totalorder %s2717_s15, %s2711_s25 }
0x2629   : > { %p2713_p12 = pnand %p2712_p11, %p2879_p5  ;;  %p2720_p2 = por %p2719_p1, %p2718_p0 }
0x262b   : > { %p2714_p13 = pneg %p2713_p12 }
0x262d   : > { %p2721_p3 = pnand %p2720_p2, %p2714_p13 }
0x2698   : > { %v2147_v55 = vpop.permute.xlu0 %2146 }
0x2699   : > { %2149 = vst.msk [vmem:[%s392_s12] sm:$0xff] %vm673_vm1, %v2147_v55 }
0x269a   : > { %2724 = shalt.err (!%p2721_p3)
}
0x269b   : > { %s2725_s14 = scalar_lea.hbm %s3407_s22, 128  ;;  %s2729_s16 = scalar_lea.hbm %s3461_s11, 256 }
0x269c   : > { %p2726_p4 = scmp.ne.s32.totalorder %s3407_s22, %s2725_s14  ;;  %p2730_p9 = scmp.lt.u32.totalorder %s3407_s22, %s3461_s11 }
0x269d   : > { %p2731_p10 = scmp.lt.u32.totalorder %s2729_s16, %s2725_s14  ;;  %p2733_p12 = scmp.lt.u32.totalorder %s2725_s14, %s3407_s22 }
0x269e   : > { %p2727_p7 = pnand %p2726_p4, %p2879_p5 }
0x269f   : > { %p2732_p11 = por %p2731_p10, %p2730_p9 }
0x26a0   : > { %p2728_p8 = pneg %p2727_p7 }
0x26a1   : > { %p2734_p13 = por %p2733_p12, %p2732_p11 }
0x26a3   : > { %p2735_p0 = pnand %p2734_p13, %p2728_p8 }
0x26a5   : > { %2738 = shalt.err (!%p2735_p0)
}
0x26a6   : > { %2576 = dma.vmem_to_hbm [thread:$0]  (%p2879_p5), %s3409_s13, 128, %s3407_s22, %s2151_s29  }
0x26a7 PF: > { %p2582_p1 = scmp.ge.s32.totalorder %s2773_s20, 2  ;;  %s2176_s25 = sand.u32 1, %s2761_s17  }
0x26a8   : > { %s2177_s15 = scalar_lea.sflag [#allocation3], %s2176_s25 }
0x26a9   : > { %p2579_p2 = pnand %p2582_p1, %p2883_p6 }
0x26ab   : > { %2756 = dma.done.wait (!%p2579_p2), %s2177_s15, 128  }
0x26ac   : > { %2758 = vsyncadd (!%p2579_p2), %s2177_s15, 4294967168  ;;  %p21_p3 = scmp.ge.s32.totalorder %s2866_s23, 4   ;;  %s3464_s17 = smov %s2765_s18 }
0x26ad   : > { %s3465_s18 = smov %s2769_s19  ;;  %s3466_s19 = smov %s2877_s26 }
0x26ae   : > { %s3467_s20 = smov %s2866_s23  ;;  %23 = sbr.rel (!%p21_p3) target bundleno = 3 (0x3), region = 102 }
0x26b5   :  { %2182 = vsyncpa [#allocation3], 1 }
0x26b6   :  { %2184 = vsyncpa [#allocation3 + $0x1], 1 }

</bundles_post_ra>
